<compile_context>
chip_gen: v5e
topology: v5e:2x2
jax: 0.10.0
libtpu: 0.0.40
codegen_flags: <defaults>
</compile_context>

<pallas_src>
import jax
import jax.numpy as jnp
from jax.experimental import pallas as pl
from jax.experimental.pallas import tpu as pltpu

HIDDEN = 30
INPUT_SIZE = 1
NGATES = 4
GATE_LANES = 128                      # each gate padded to its own 128-lane block
GATES_W = NGATES * GATE_LANES         # 512


def _round_up(n, m):
    return ((n + m - 1) // m) * m


# ----------------------------- kernel ---------------------------------------


def lstm_kernel(x_ref,                 # (TB, T)        squeezed input
                wih_f_ref, b_f_ref,    # (1, 512) each  forward input weights / bias
                whh_f_ref,             # (128, 512)     forward recurrent weights (pre-T, padded)
                wih_b_ref, b_b_ref,    # (1, 512) each  backward input weights / bias
                out_ref):              # (TB, 256)      [h_fwd_pad | h_bwd_pad]
    TB, T = x_ref.shape

    x = x_ref[...]                     # (TB, T)
    wih_f = wih_f_ref[...]             # (1, 512)
    b_f = b_f_ref[...]                 # (1, 512)
    whh_f = whh_f_ref[...]             # (128, 512)

    # ---- backward direction: one reverse step on x[:, T-1] from zero state ----
    # (h0 = c0 = 0, so the recurrent matmul contributes nothing and f-gate is unused)
    gates_b = x[:, T - 1:T] * wih_b_ref[...] + b_b_ref[...]                 # (TB, 512)
    c_b = jax.nn.sigmoid(gates_b[:, 0:GATE_LANES]) * \
        jnp.tanh(gates_b[:, 2 * GATE_LANES:3 * GATE_LANES])
    h_b = jax.nn.sigmoid(gates_b[:, 3 * GATE_LANES:4 * GATE_LANES]) * jnp.tanh(c_b)

    # ---- forward direction: statically unrolled recurrence ----
    h = jnp.zeros((TB, GATE_LANES), jnp.float32)
    c = jnp.zeros((TB, GATE_LANES), jnp.float32)
    for t in range(T):
        # input projection: outer product as broadcast multiply (I == 1), no MXU
        gates = x[:, t:t + 1] * wih_f + b_f                                 # (TB, 512)
        if t > 0:   # at t == 0, h == 0 -> recurrent term is exactly zero
            gates = gates + jnp.dot(h, whh_f, preferred_element_type=jnp.float32)
        i = jax.nn.sigmoid(gates[:, 0:GATE_LANES])
        f = jax.nn.sigmoid(gates[:, GATE_LANES:2 * GATE_LANES])
        g = jnp.tanh(gates[:, 2 * GATE_LANES:3 * GATE_LANES])
        o = jax.nn.sigmoid(gates[:, 3 * GATE_LANES:4 * GATE_LANES])
        c = f * c + i * g
        h = o * jnp.tanh(c)
        # padded lanes (>= HIDDEN) stay 0: padded weight/bias lanes are 0 -> g = tanh(0) = 0
        # and c starts at 0, so c_pad = 0 and h_pad = sigmoid(0)*tanh(0) = 0.

    # lane-dense, 128-aligned stores
    out_ref[:, 0:GATE_LANES] = h
    out_ref[:, GATE_LANES:2 * GATE_LANES] = h_b


# ----------------------------- parameter packing ----------------------------


def _pack_gate_vec(v):
    """(4H,) -> (1, 4*128): gate g occupies lanes [g*128, g*128+H), rest zero."""
    v4 = v.reshape(NGATES, HIDDEN)
    out = jnp.zeros((NGATES, GATE_LANES), jnp.float32).at[:, :HIDDEN].set(v4)
    return out.reshape(1, GATES_W)


def _pack_whh(whh):
    """(4H, H) -> (128, 4*128): pre-transposed, each gate in its own 128-lane block."""
    w = whh.reshape(NGATES, HIDDEN, HIDDEN)        # [g, j, i]   (j = gate unit, i = h index)
    w = jnp.transpose(w, (2, 0, 1))                # [i, g, j]
    out = jnp.zeros((GATE_LANES, NGATES, GATE_LANES), jnp.float32)
    out = out.at[:HIDDEN, :, :HIDDEN].set(w)
    return out.reshape(GATE_LANES, GATES_W)


# ----------------------------- wrapper ---------------------------------------


def lstm_net_forward(x, params):
    """x: (B, T, INPUT_SIZE) float32 -> (B, 2*HIDDEN) float32 (== PyTorch r_out[:, -1])."""
    wih_f, whh_f, b_f, wih_b, whh_b, b_b = params
    del whh_b  # mathematically unused: backward output at t=T-1 starts from zero state
    B, T, I = x.shape
    assert I == INPUT_SIZE

    # squeeze trailing I=1 dim -> (B, T), lane-dense sequence layout
    x2 = x[..., 0]

    # batch tiling: 256-row tiles fill the v6e/v7x MXU; small batches use one padded tile.
    # (on v5e a 128-row tile would also be a fine choice; 256 just serializes into 2 passes)
    if B <= 256:
        TB = _round_up(B, 8)
    else:
        TB = 256
    B_pad = _round_up(B, TB)
    if B_pad != B:
        x2 = jnp.pad(x2, ((0, B_pad - B), (0, 0)))

    # pack / pad / pre-transpose weights once, outside the kernel
    wih_f_p = _pack_gate_vec(wih_f[:, 0])
    b_f_p = _pack_gate_vec(b_f.reshape(-1))
    whh_f_p = _pack_whh(whh_f)
    wih_b_p = _pack_gate_vec(wih_b[:, 0])
    b_b_p = _pack_gate_vec(b_b.reshape(-1))

    grid = (B_pad // TB,)
    full = lambda b: (0, 0)  # noqa: E731  (weights: same block every grid step)

    out_pad = pl.pallas_call(
        lstm_kernel,
        out_shape=jax.ShapeDtypeStruct((B_pad, 2 * GATE_LANES), jnp.float32),
        grid=grid,
        in_specs=[
            pl.BlockSpec((TB, T), lambda b: (b, 0)),
            pl.BlockSpec((1, GATES_W), full),
            pl.BlockSpec((1, GATES_W), full),
            pl.BlockSpec((GATE_LANES, GATES_W), full),
            pl.BlockSpec((1, GATES_W), full),
            pl.BlockSpec((1, GATES_W), full),
        ],
        out_specs=pl.BlockSpec((TB, 2 * GATE_LANES), lambda b: (b, 0)),
        compiler_params=pltpu.CompilerParams(
            dimension_semantics=("parallel",)),   # batch axis shards across TCs on v7x
    )(x2, wih_f_p, b_f_p, whh_f_p, wih_b_p, b_b_p)

    # slice the valid lanes back out: [h_fwd(0:30) | h_bwd(128:158)] -> (B, 60)
    return jnp.concatenate(
        [out_pad[:B, :HIDDEN], out_pad[:B, GATE_LANES:GATE_LANES + HIDDEN]], axis=-1)


# ----------------------------- init & reference ------------------------------


def init_params(key, hidden=HIDDEN, input_size=INPUT_SIZE):
    """Deterministic init matching PyTorch nn.LSTM parameter shapes.

    PyTorch uses U(-1/sqrt(H), 1/sqrt(H)); we combine b_ih + b_hh into one bias per
    direction (mathematically identical).
    """
    k = 1.0 / jnp.sqrt(jnp.float32(hidden))
    keys = jax.random.split(key, 8)

    def u(kk, shape):
        return jax.random.uniform(kk, shape, jnp.float32, minval=-k, maxval=k)

    wih_f = u(keys[0], (4 * hidden, input_size))
    whh_f = u(keys[1], (4 * hidden, hidden))
    b_f = u(keys[2], (1, 4 * hidden)) + u(keys[3], (1, 4 * hidden))
    wih_b = u(keys[4], (4 * hidden, input_size))
    whh_b = u(keys[5], (4 * hidden, hidden))
    b_b = u(keys[6], (1, 4 * hidden)) + u(keys[7], (1, 4 * hidden))
    return wih_f, whh_f, b_f, wih_b, whh_b, b_b


def reference_forward(x, params):
    """Pure-JAX reference of the same math (full bidirectional LSTM, r_out[:, -1])."""
    wih_f, whh_f, b_f, wih_b, whh_b, b_b = params
    B, T, _ = x.shape
    H = HIDDEN
    h0 = jnp.zeros((B, H), jnp.float32)
    c0 = jnp.zeros((B, H), jnp.float32)

    def cell(x_t, h, c, wih, whh, b):
        gates = (x_t @ wih.T
                 + jnp.dot(h, whh.T, precision=jax.lax.Precision.HIGHEST)
                 + b)
        i = jax.nn.sigmoid(gates[:, 0 * H:1 * H])
        f = jax.nn.sigmoid(gates[:, 1 * H:2 * H])
        g = jnp.tanh(gates[:, 2 * H:3 * H])
        o = jax.nn.sigmoid(gates[:, 3 * H:4 * H])
        c_new = f * c + i * g
        return o * jnp.tanh(c_new), c_new

    h, c = h0, c0
    for t in range(T):
        h, c = cell(x[:, t, :], h, c, wih_f, whh_f, b_f)
    h_fwd = h
    # backward direction processes x reversed; its output at original index T-1
    # is the hidden after one step on x[:, T-1] from the zero initial state.
    h_bwd, _ = cell(x[:, T - 1, :], h0, c0, wih_b, whh_b, b_b)
    return jnp.concatenate([h_fwd, h_bwd], axis=-1)


# TODO(synk): num_layers (depth) > 1 is not implemented; the module's default depth=1 is.

if __name__ == "__main__":
    key = jax.random.PRNGKey(0)
    kx, kp = jax.random.split(key)

    B, T = 2, 8
    x = jax.random.normal(kx, (B, T, INPUT_SIZE), dtype=jnp.float32)
    params = init_params(kp)

    out = lstm_net_forward(x, params)
    out = jax.block_until_ready(out)

    ref = reference_forward(x, params)
    assert out.shape == (B, 2 * HIDDEN)
    assert jnp.allclose(out, ref, atol=2e-5, rtol=2e-5), "mismatch vs pure-JAX reference"

    print("KERNEL_OK")
</pallas_src>

<mosaic_0001>
module attributes {stable_mosaic.version = 11 : i64} {
  func.func @lstm_kernel(%arg0: i32, %arg1: memref<8x8xf32, #tpu.memory_space<vmem>>, %arg2: memref<1x512xf32, #tpu.memory_space<vmem>>, %arg3: memref<1x512xf32, #tpu.memory_space<vmem>>, %arg4: memref<128x512xf32, #tpu.memory_space<vmem>>, %arg5: memref<1x512xf32, #tpu.memory_space<vmem>>, %arg6: memref<1x512xf32, #tpu.memory_space<vmem>>, %arg7: memref<8x256xf32, #tpu.memory_space<vmem>>) attributes {dimension_semantics = [#tpu.dimension_semantics<parallel>], iteration_bounds = array<i64: 1>, scalar_prefetch = 0 : i64, scratch_operands = 0 : i64, tpu.core_type = #tpu.core_type<tc>, window_params = [{transform_indices = @transform_0, window_bounds = array<i64: 8, 8>}, {pipeline_mode = #tpu.pipeline_mode<synchronous>, transform_indices = @transform_1, window_bounds = array<i64: 1, 512>}, {pipeline_mode = #tpu.pipeline_mode<synchronous>, transform_indices = @transform_2, window_bounds = array<i64: 1, 512>}, {pipeline_mode = #tpu.pipeline_mode<synchronous>, transform_indices = @transform_3, window_bounds = array<i64: 128, 512>}, {pipeline_mode = #tpu.pipeline_mode<synchronous>, transform_indices = @transform_4, window_bounds = array<i64: 1, 512>}, {pipeline_mode = #tpu.pipeline_mode<synchronous>, transform_indices = @transform_5, window_bounds = array<i64: 1, 512>}, {transform_indices = @transform_6, window_bounds = array<i64: 8, 256>}]} {
    %c0 = arith.constant 0 : index
    %c0_0 = arith.constant 0 : index
    %0 = vector.load %arg1[%c0, %c0_0] : memref<8x8xf32, #tpu.memory_space<vmem>>, vector<8x8xf32>
    %c0_1 = arith.constant 0 : index
    %c0_2 = arith.constant 0 : index
    %1 = vector.load %arg2[%c0_1, %c0_2] : memref<1x512xf32, #tpu.memory_space<vmem>>, vector<1x512xf32>
    %c0_3 = arith.constant 0 : index
    %c0_4 = arith.constant 0 : index
    %2 = vector.load %arg3[%c0_3, %c0_4] : memref<1x512xf32, #tpu.memory_space<vmem>>, vector<1x512xf32>
    %c0_5 = arith.constant 0 : index
    %c0_6 = arith.constant 0 : index
    %3 = vector.load %arg4[%c0_5, %c0_6] : memref<128x512xf32, #tpu.memory_space<vmem>>, vector<128x512xf32>
    %4 = vector.extract_strided_slice %0 {offsets = [0, 7], sizes = [8, 1], strides = [1, 1]} : vector<8x8xf32> to vector<8x1xf32>
    %c0_7 = arith.constant 0 : index
    %c0_8 = arith.constant 0 : index
    %5 = vector.load %arg5[%c0_7, %c0_8] : memref<1x512xf32, #tpu.memory_space<vmem>>, vector<1x512xf32>
    %6 = vector.broadcast %4 : vector<8x1xf32> to vector<8x512xf32>
    %7 = vector.broadcast %5 : vector<1x512xf32> to vector<8x512xf32>
    %8 = arith.mulf %6, %7 : vector<8x512xf32>
    %c0_9 = arith.constant 0 : index
    %c0_10 = arith.constant 0 : index
    %9 = vector.load %arg6[%c0_9, %c0_10] : memref<1x512xf32, #tpu.memory_space<vmem>>, vector<1x512xf32>
    %10 = vector.broadcast %9 : vector<1x512xf32> to vector<8x512xf32>
    %11 = arith.addf %8, %10 : vector<8x512xf32>
    %12 = vector.extract_strided_slice %11 {offsets = [0, 0], sizes = [8, 128], strides = [1, 1]} : vector<8x512xf32> to vector<8x128xf32>
    %13 = arith.negf %12 : vector<8x128xf32>
    %14 = math.exp %13 : vector<8x128xf32>
    %cst = arith.constant 1.000000e+00 : f32
    %15 = vector.broadcast %cst : f32 to vector<8x128xf32>
    %16 = arith.addf %15, %14 : vector<8x128xf32>
    %17 = arith.divf %15, %16 : vector<8x128xf32>
    %18 = vector.extract_strided_slice %11 {offsets = [0, 256], sizes = [8, 128], strides = [1, 1]} : vector<8x512xf32> to vector<8x128xf32>
    %19 = math.tanh %18 : vector<8x128xf32>
    %20 = arith.mulf %17, %19 : vector<8x128xf32>
    %21 = vector.extract_strided_slice %11 {offsets = [0, 384], sizes = [8, 128], strides = [1, 1]} : vector<8x512xf32> to vector<8x128xf32>
    %22 = arith.negf %21 : vector<8x128xf32>
    %23 = math.exp %22 : vector<8x128xf32>
    %cst_11 = arith.constant 1.000000e+00 : f32
    %24 = vector.broadcast %cst_11 : f32 to vector<8x128xf32>
    %25 = arith.addf %24, %23 : vector<8x128xf32>
    %26 = arith.divf %24, %25 : vector<8x128xf32>
    %27 = math.tanh %20 : vector<8x128xf32>
    %28 = arith.mulf %26, %27 : vector<8x128xf32>
    %cst_12 = arith.constant 0.000000e+00 : f32
    %29 = vector.broadcast %cst_12 : f32 to vector<8x128xf32>
    %30 = vector.extract_strided_slice %0 {offsets = [0, 0], sizes = [8, 1], strides = [1, 1]} : vector<8x8xf32> to vector<8x1xf32>
    %31 = vector.broadcast %30 : vector<8x1xf32> to vector<8x512xf32>
    %32 = vector.broadcast %1 : vector<1x512xf32> to vector<8x512xf32>
    %33 = arith.mulf %31, %32 : vector<8x512xf32>
    %34 = vector.broadcast %2 : vector<1x512xf32> to vector<8x512xf32>
    %35 = arith.addf %33, %34 : vector<8x512xf32>
    %36 = vector.extract_strided_slice %35 {offsets = [0, 0], sizes = [8, 128], strides = [1, 1]} : vector<8x512xf32> to vector<8x128xf32>
    %37 = arith.negf %36 : vector<8x128xf32>
    %38 = math.exp %37 : vector<8x128xf32>
    %cst_13 = arith.constant 1.000000e+00 : f32
    %39 = vector.broadcast %cst_13 : f32 to vector<8x128xf32>
    %40 = arith.addf %39, %38 : vector<8x128xf32>
    %41 = arith.divf %39, %40 : vector<8x128xf32>
    %42 = vector.extract_strided_slice %35 {offsets = [0, 128], sizes = [8, 128], strides = [1, 1]} : vector<8x512xf32> to vector<8x128xf32>
    %43 = arith.negf %42 : vector<8x128xf32>
    %44 = math.exp %43 : vector<8x128xf32>
    %cst_14 = arith.constant 1.000000e+00 : f32
    %45 = vector.broadcast %cst_14 : f32 to vector<8x128xf32>
    %46 = arith.addf %45, %44 : vector<8x128xf32>
    %47 = arith.divf %45, %46 : vector<8x128xf32>
    %48 = vector.extract_strided_slice %35 {offsets = [0, 256], sizes = [8, 128], strides = [1, 1]} : vector<8x512xf32> to vector<8x128xf32>
    %49 = math.tanh %48 : vector<8x128xf32>
    %50 = vector.extract_strided_slice %35 {offsets = [0, 384], sizes = [8, 128], strides = [1, 1]} : vector<8x512xf32> to vector<8x128xf32>
    %51 = arith.negf %50 : vector<8x128xf32>
    %52 = math.exp %51 : vector<8x128xf32>
    %cst_15 = arith.constant 1.000000e+00 : f32
    %53 = vector.broadcast %cst_15 : f32 to vector<8x128xf32>
    %54 = arith.addf %53, %52 : vector<8x128xf32>
    %55 = arith.divf %53, %54 : vector<8x128xf32>
    %56 = arith.mulf %47, %29 : vector<8x128xf32>
    %57 = arith.mulf %41, %49 : vector<8x128xf32>
    %58 = arith.addf %56, %57 : vector<8x128xf32>
    %59 = math.tanh %58 : vector<8x128xf32>
    %60 = arith.mulf %55, %59 : vector<8x128xf32>
    %61 = vector.extract_strided_slice %0 {offsets = [0, 1], sizes = [8, 1], strides = [1, 1]} : vector<8x8xf32> to vector<8x1xf32>
    %62 = vector.broadcast %61 : vector<8x1xf32> to vector<8x512xf32>
    %63 = vector.broadcast %1 : vector<1x512xf32> to vector<8x512xf32>
    %64 = arith.mulf %62, %63 : vector<8x512xf32>
    %65 = vector.broadcast %2 : vector<1x512xf32> to vector<8x512xf32>
    %66 = arith.addf %64, %65 : vector<8x512xf32>
    %cst_16 = arith.constant dense<0.000000e+00> : vector<8x512xf32>
    %67 = tpu.matmul %60, %3, %cst_16 {dimension_numbers = #tpu.dot_dimension_numbers<[1], [0], [0], [1], [0, 0, 1, 1], [], []>} : vector<8x128xf32>, vector<128x512xf32>, vector<8x512xf32> -> vector<8x512xf32>
    %68 = arith.addf %66, %67 : vector<8x512xf32>
    %69 = vector.extract_strided_slice %68 {offsets = [0, 0], sizes = [8, 128], strides = [1, 1]} : vector<8x512xf32> to vector<8x128xf32>
    %70 = arith.negf %69 : vector<8x128xf32>
    %71 = math.exp %70 : vector<8x128xf32>
    %cst_17 = arith.constant 1.000000e+00 : f32
    %72 = vector.broadcast %cst_17 : f32 to vector<8x128xf32>
    %73 = arith.addf %72, %71 : vector<8x128xf32>
    %74 = arith.divf %72, %73 : vector<8x128xf32>
    %75 = vector.extract_strided_slice %68 {offsets = [0, 128], sizes = [8, 128], strides = [1, 1]} : vector<8x512xf32> to vector<8x128xf32>
    %76 = arith.negf %75 : vector<8x128xf32>
    %77 = math.exp %76 : vector<8x128xf32>
    %cst_18 = arith.constant 1.000000e+00 : f32
    %78 = vector.broadcast %cst_18 : f32 to vector<8x128xf32>
    %79 = arith.addf %78, %77 : vector<8x128xf32>
    %80 = arith.divf %78, %79 : vector<8x128xf32>
    %81 = vector.extract_strided_slice %68 {offsets = [0, 256], sizes = [8, 128], strides = [1, 1]} : vector<8x512xf32> to vector<8x128xf32>
    %82 = math.tanh %81 : vector<8x128xf32>
    %83 = vector.extract_strided_slice %68 {offsets = [0, 384], sizes = [8, 128], strides = [1, 1]} : vector<8x512xf32> to vector<8x128xf32>
    %84 = arith.negf %83 : vector<8x128xf32>
    %85 = math.exp %84 : vector<8x128xf32>
    %cst_19 = arith.constant 1.000000e+00 : f32
    %86 = vector.broadcast %cst_19 : f32 to vector<8x128xf32>
    %87 = arith.addf %86, %85 : vector<8x128xf32>
    %88 = arith.divf %86, %87 : vector<8x128xf32>
    %89 = arith.mulf %80, %58 : vector<8x128xf32>
    %90 = arith.mulf %74, %82 : vector<8x128xf32>
    %91 = arith.addf %89, %90 : vector<8x128xf32>
    %92 = math.tanh %91 : vector<8x128xf32>
    %93 = arith.mulf %88, %92 : vector<8x128xf32>
    %94 = vector.extract_strided_slice %0 {offsets = [0, 2], sizes = [8, 1], strides = [1, 1]} : vector<8x8xf32> to vector<8x1xf32>
    %95 = vector.broadcast %94 : vector<8x1xf32> to vector<8x512xf32>
    %96 = vector.broadcast %1 : vector<1x512xf32> to vector<8x512xf32>
    %97 = arith.mulf %95, %96 : vector<8x512xf32>
    %98 = vector.broadcast %2 : vector<1x512xf32> to vector<8x512xf32>
    %99 = arith.addf %97, %98 : vector<8x512xf32>
    %cst_20 = arith.constant dense<0.000000e+00> : vector<8x512xf32>
    %100 = tpu.matmul %93, %3, %cst_20 {dimension_numbers = #tpu.dot_dimension_numbers<[1], [0], [0], [1], [0, 0, 1, 1], [], []>} : vector<8x128xf32>, vector<128x512xf32>, vector<8x512xf32> -> vector<8x512xf32>
    %101 = arith.addf %99, %100 : vector<8x512xf32>
    %102 = vector.extract_strided_slice %101 {offsets = [0, 0], sizes = [8, 128], strides = [1, 1]} : vector<8x512xf32> to vector<8x128xf32>
    %103 = arith.negf %102 : vector<8x128xf32>
    %104 = math.exp %103 : vector<8x128xf32>
    %cst_21 = arith.constant 1.000000e+00 : f32
    %105 = vector.broadcast %cst_21 : f32 to vector<8x128xf32>
    %106 = arith.addf %105, %104 : vector<8x128xf32>
    %107 = arith.divf %105, %106 : vector<8x128xf32>
    %108 = vector.extract_strided_slice %101 {offsets = [0, 128], sizes = [8, 128], strides = [1, 1]} : vector<8x512xf32> to vector<8x128xf32>
    %109 = arith.negf %108 : vector<8x128xf32>
    %110 = math.exp %109 : vector<8x128xf32>
    %cst_22 = arith.constant 1.000000e+00 : f32
    %111 = vector.broadcast %cst_22 : f32 to vector<8x128xf32>
    %112 = arith.addf %111, %110 : vector<8x128xf32>
    %113 = arith.divf %111, %112 : vector<8x128xf32>
    %114 = vector.extract_strided_slice %101 {offsets = [0, 256], sizes = [8, 128], strides = [1, 1]} : vector<8x512xf32> to vector<8x128xf32>
    %115 = math.tanh %114 : vector<8x128xf32>
    %116 = vector.extract_strided_slice %101 {offsets = [0, 384], sizes = [8, 128], strides = [1, 1]} : vector<8x512xf32> to vector<8x128xf32>
    %117 = arith.negf %116 : vector<8x128xf32>
    %118 = math.exp %117 : vector<8x128xf32>
    %cst_23 = arith.constant 1.000000e+00 : f32
    %119 = vector.broadcast %cst_23 : f32 to vector<8x128xf32>
    %120 = arith.addf %119, %118 : vector<8x128xf32>
    %121 = arith.divf %119, %120 : vector<8x128xf32>
    %122 = arith.mulf %113, %91 : vector<8x128xf32>
    %123 = arith.mulf %107, %115 : vector<8x128xf32>
    %124 = arith.addf %122, %123 : vector<8x128xf32>
    %125 = math.tanh %124 : vector<8x128xf32>
    %126 = arith.mulf %121, %125 : vector<8x128xf32>
    %127 = vector.extract_strided_slice %0 {offsets = [0, 3], sizes = [8, 1], strides = [1, 1]} : vector<8x8xf32> to vector<8x1xf32>
    %128 = vector.broadcast %127 : vector<8x1xf32> to vector<8x512xf32>
    %129 = vector.broadcast %1 : vector<1x512xf32> to vector<8x512xf32>
    %130 = arith.mulf %128, %129 : vector<8x512xf32>
    %131 = vector.broadcast %2 : vector<1x512xf32> to vector<8x512xf32>
    %132 = arith.addf %130, %131 : vector<8x512xf32>
    %cst_24 = arith.constant dense<0.000000e+00> : vector<8x512xf32>
    %133 = tpu.matmul %126, %3, %cst_24 {dimension_numbers = #tpu.dot_dimension_numbers<[1], [0], [0], [1], [0, 0, 1, 1], [], []>} : vector<8x128xf32>, vector<128x512xf32>, vector<8x512xf32> -> vector<8x512xf32>
    %134 = arith.addf %132, %133 : vector<8x512xf32>
    %135 = vector.extract_strided_slice %134 {offsets = [0, 0], sizes = [8, 128], strides = [1, 1]} : vector<8x512xf32> to vector<8x128xf32>
    %136 = arith.negf %135 : vector<8x128xf32>
    %137 = math.exp %136 : vector<8x128xf32>
    %cst_25 = arith.constant 1.000000e+00 : f32
    %138 = vector.broadcast %cst_25 : f32 to vector<8x128xf32>
    %139 = arith.addf %138, %137 : vector<8x128xf32>
    %140 = arith.divf %138, %139 : vector<8x128xf32>
    %141 = vector.extract_strided_slice %134 {offsets = [0, 128], sizes = [8, 128], strides = [1, 1]} : vector<8x512xf32> to vector<8x128xf32>
    %142 = arith.negf %141 : vector<8x128xf32>
    %143 = math.exp %142 : vector<8x128xf32>
    %cst_26 = arith.constant 1.000000e+00 : f32
    %144 = vector.broadcast %cst_26 : f32 to vector<8x128xf32>
    %145 = arith.addf %144, %143 : vector<8x128xf32>
    %146 = arith.divf %144, %145 : vector<8x128xf32>
    %147 = vector.extract_strided_slice %134 {offsets = [0, 256], sizes = [8, 128], strides = [1, 1]} : vector<8x512xf32> to vector<8x128xf32>
    %148 = math.tanh %147 : vector<8x128xf32>
    %149 = vector.extract_strided_slice %134 {offsets = [0, 384], sizes = [8, 128], strides = [1, 1]} : vector<8x512xf32> to vector<8x128xf32>
    %150 = arith.negf %149 : vector<8x128xf32>
    %151 = math.exp %150 : vector<8x128xf32>
    %cst_27 = arith.constant 1.000000e+00 : f32
    %152 = vector.broadcast %cst_27 : f32 to vector<8x128xf32>
    %153 = arith.addf %152, %151 : vector<8x128xf32>
    %154 = arith.divf %152, %153 : vector<8x128xf32>
    %155 = arith.mulf %146, %124 : vector<8x128xf32>
    %156 = arith.mulf %140, %148 : vector<8x128xf32>
    %157 = arith.addf %155, %156 : vector<8x128xf32>
    %158 = math.tanh %157 : vector<8x128xf32>
    %159 = arith.mulf %154, %158 : vector<8x128xf32>
    %160 = vector.extract_strided_slice %0 {offsets = [0, 4], sizes = [8, 1], strides = [1, 1]} : vector<8x8xf32> to vector<8x1xf32>
    %161 = vector.broadcast %160 : vector<8x1xf32> to vector<8x512xf32>
    %162 = vector.broadcast %1 : vector<1x512xf32> to vector<8x512xf32>
    %163 = arith.mulf %161, %162 : vector<8x512xf32>
    %164 = vector.broadcast %2 : vector<1x512xf32> to vector<8x512xf32>
    %165 = arith.addf %163, %164 : vector<8x512xf32>
    %cst_28 = arith.constant dense<0.000000e+00> : vector<8x512xf32>
    %166 = tpu.matmul %159, %3, %cst_28 {dimension_numbers = #tpu.dot_dimension_numbers<[1], [0], [0], [1], [0, 0, 1, 1], [], []>} : vector<8x128xf32>, vector<128x512xf32>, vector<8x512xf32> -> vector<8x512xf32>
    %167 = arith.addf %165, %166 : vector<8x512xf32>
    %168 = vector.extract_strided_slice %167 {offsets = [0, 0], sizes = [8, 128], strides = [1, 1]} : vector<8x512xf32> to vector<8x128xf32>
    %169 = arith.negf %168 : vector<8x128xf32>
    %170 = math.exp %169 : vector<8x128xf32>
    %cst_29 = arith.constant 1.000000e+00 : f32
    %171 = vector.broadcast %cst_29 : f32 to vector<8x128xf32>
    %172 = arith.addf %171, %170 : vector<8x128xf32>
    %173 = arith.divf %171, %172 : vector<8x128xf32>
    %174 = vector.extract_strided_slice %167 {offsets = [0, 128], sizes = [8, 128], strides = [1, 1]} : vector<8x512xf32> to vector<8x128xf32>
    %175 = arith.negf %174 : vector<8x128xf32>
    %176 = math.exp %175 : vector<8x128xf32>
    %cst_30 = arith.constant 1.000000e+00 : f32
    %177 = vector.broadcast %cst_30 : f32 to vector<8x128xf32>
    %178 = arith.addf %177, %176 : vector<8x128xf32>
    %179 = arith.divf %177, %178 : vector<8x128xf32>
    %180 = vector.extract_strided_slice %167 {offsets = [0, 256], sizes = [8, 128], strides = [1, 1]} : vector<8x512xf32> to vector<8x128xf32>
    %181 = math.tanh %180 : vector<8x128xf32>
    %182 = vector.extract_strided_slice %167 {offsets = [0, 384], sizes = [8, 128], strides = [1, 1]} : vector<8x512xf32> to vector<8x128xf32>
    %183 = arith.negf %182 : vector<8x128xf32>
    %184 = math.exp %183 : vector<8x128xf32>
    %cst_31 = arith.constant 1.000000e+00 : f32
    %185 = vector.broadcast %cst_31 : f32 to vector<8x128xf32>
    %186 = arith.addf %185, %184 : vector<8x128xf32>
    %187 = arith.divf %185, %186 : vector<8x128xf32>
    %188 = arith.mulf %179, %157 : vector<8x128xf32>
    %189 = arith.mulf %173, %181 : vector<8x128xf32>
    %190 = arith.addf %188, %189 : vector<8x128xf32>
    %191 = math.tanh %190 : vector<8x128xf32>
    %192 = arith.mulf %187, %191 : vector<8x128xf32>
    %193 = vector.extract_strided_slice %0 {offsets = [0, 5], sizes = [8, 1], strides = [1, 1]} : vector<8x8xf32> to vector<8x1xf32>
    %194 = vector.broadcast %193 : vector<8x1xf32> to vector<8x512xf32>
    %195 = vector.broadcast %1 : vector<1x512xf32> to vector<8x512xf32>
    %196 = arith.mulf %194, %195 : vector<8x512xf32>
    %197 = vector.broadcast %2 : vector<1x512xf32> to vector<8x512xf32>
    %198 = arith.addf %196, %197 : vector<8x512xf32>
    %cst_32 = arith.constant dense<0.000000e+00> : vector<8x512xf32>
    %199 = tpu.matmul %192, %3, %cst_32 {dimension_numbers = #tpu.dot_dimension_numbers<[1], [0], [0], [1], [0, 0, 1, 1], [], []>} : vector<8x128xf32>, vector<128x512xf32>, vector<8x512xf32> -> vector<8x512xf32>
    %200 = arith.addf %198, %199 : vector<8x512xf32>
    %201 = vector.extract_strided_slice %200 {offsets = [0, 0], sizes = [8, 128], strides = [1, 1]} : vector<8x512xf32> to vector<8x128xf32>
    %202 = arith.negf %201 : vector<8x128xf32>
    %203 = math.exp %202 : vector<8x128xf32>
    %cst_33 = arith.constant 1.000000e+00 : f32
    %204 = vector.broadcast %cst_33 : f32 to vector<8x128xf32>
    %205 = arith.addf %204, %203 : vector<8x128xf32>
    %206 = arith.divf %204, %205 : vector<8x128xf32>
    %207 = vector.extract_strided_slice %200 {offsets = [0, 128], sizes = [8, 128], strides = [1, 1]} : vector<8x512xf32> to vector<8x128xf32>
    %208 = arith.negf %207 : vector<8x128xf32>
    %209 = math.exp %208 : vector<8x128xf32>
    %cst_34 = arith.constant 1.000000e+00 : f32
    %210 = vector.broadcast %cst_34 : f32 to vector<8x128xf32>
    %211 = arith.addf %210, %209 : vector<8x128xf32>
    %212 = arith.divf %210, %211 : vector<8x128xf32>
    %213 = vector.extract_strided_slice %200 {offsets = [0, 256], sizes = [8, 128], strides = [1, 1]} : vector<8x512xf32> to vector<8x128xf32>
    %214 = math.tanh %213 : vector<8x128xf32>
    %215 = vector.extract_strided_slice %200 {offsets = [0, 384], sizes = [8, 128], strides = [1, 1]} : vector<8x512xf32> to vector<8x128xf32>
    %216 = arith.negf %215 : vector<8x128xf32>
    %217 = math.exp %216 : vector<8x128xf32>
    %cst_35 = arith.constant 1.000000e+00 : f32
    %218 = vector.broadcast %cst_35 : f32 to vector<8x128xf32>
    %219 = arith.addf %218, %217 : vector<8x128xf32>
    %220 = arith.divf %218, %219 : vector<8x128xf32>
    %221 = arith.mulf %212, %190 : vector<8x128xf32>
    %222 = arith.mulf %206, %214 : vector<8x128xf32>
    %223 = arith.addf %221, %222 : vector<8x128xf32>
    %224 = math.tanh %223 : vector<8x128xf32>
    %225 = arith.mulf %220, %224 : vector<8x128xf32>
    %226 = vector.extract_strided_slice %0 {offsets = [0, 6], sizes = [8, 1], strides = [1, 1]} : vector<8x8xf32> to vector<8x1xf32>
    %227 = vector.broadcast %226 : vector<8x1xf32> to vector<8x512xf32>
    %228 = vector.broadcast %1 : vector<1x512xf32> to vector<8x512xf32>
    %229 = arith.mulf %227, %228 : vector<8x512xf32>
    %230 = vector.broadcast %2 : vector<1x512xf32> to vector<8x512xf32>
    %231 = arith.addf %229, %230 : vector<8x512xf32>
    %cst_36 = arith.constant dense<0.000000e+00> : vector<8x512xf32>
    %232 = tpu.matmul %225, %3, %cst_36 {dimension_numbers = #tpu.dot_dimension_numbers<[1], [0], [0], [1], [0, 0, 1, 1], [], []>} : vector<8x128xf32>, vector<128x512xf32>, vector<8x512xf32> -> vector<8x512xf32>
    %233 = arith.addf %231, %232 : vector<8x512xf32>
    %234 = vector.extract_strided_slice %233 {offsets = [0, 0], sizes = [8, 128], strides = [1, 1]} : vector<8x512xf32> to vector<8x128xf32>
    %235 = arith.negf %234 : vector<8x128xf32>
    %236 = math.exp %235 : vector<8x128xf32>
    %cst_37 = arith.constant 1.000000e+00 : f32
    %237 = vector.broadcast %cst_37 : f32 to vector<8x128xf32>
    %238 = arith.addf %237, %236 : vector<8x128xf32>
    %239 = arith.divf %237, %238 : vector<8x128xf32>
    %240 = vector.extract_strided_slice %233 {offsets = [0, 128], sizes = [8, 128], strides = [1, 1]} : vector<8x512xf32> to vector<8x128xf32>
    %241 = arith.negf %240 : vector<8x128xf32>
    %242 = math.exp %241 : vector<8x128xf32>
    %cst_38 = arith.constant 1.000000e+00 : f32
    %243 = vector.broadcast %cst_38 : f32 to vector<8x128xf32>
    %244 = arith.addf %243, %242 : vector<8x128xf32>
    %245 = arith.divf %243, %244 : vector<8x128xf32>
    %246 = vector.extract_strided_slice %233 {offsets = [0, 256], sizes = [8, 128], strides = [1, 1]} : vector<8x512xf32> to vector<8x128xf32>
    %247 = math.tanh %246 : vector<8x128xf32>
    %248 = vector.extract_strided_slice %233 {offsets = [0, 384], sizes = [8, 128], strides = [1, 1]} : vector<8x512xf32> to vector<8x128xf32>
    %249 = arith.negf %248 : vector<8x128xf32>
    %250 = math.exp %249 : vector<8x128xf32>
    %cst_39 = arith.constant 1.000000e+00 : f32
    %251 = vector.broadcast %cst_39 : f32 to vector<8x128xf32>
    %252 = arith.addf %251, %250 : vector<8x128xf32>
    %253 = arith.divf %251, %252 : vector<8x128xf32>
    %254 = arith.mulf %245, %223 : vector<8x128xf32>
    %255 = arith.mulf %239, %247 : vector<8x128xf32>
    %256 = arith.addf %254, %255 : vector<8x128xf32>
    %257 = math.tanh %256 : vector<8x128xf32>
    %258 = arith.mulf %253, %257 : vector<8x128xf32>
    %259 = vector.extract_strided_slice %0 {offsets = [0, 7], sizes = [8, 1], strides = [1, 1]} : vector<8x8xf32> to vector<8x1xf32>
    %260 = vector.broadcast %259 : vector<8x1xf32> to vector<8x512xf32>
    %261 = vector.broadcast %1 : vector<1x512xf32> to vector<8x512xf32>
    %262 = arith.mulf %260, %261 : vector<8x512xf32>
    %263 = vector.broadcast %2 : vector<1x512xf32> to vector<8x512xf32>
    %264 = arith.addf %262, %263 : vector<8x512xf32>
    %cst_40 = arith.constant dense<0.000000e+00> : vector<8x512xf32>
    %265 = tpu.matmul %258, %3, %cst_40 {dimension_numbers = #tpu.dot_dimension_numbers<[1], [0], [0], [1], [0, 0, 1, 1], [], []>} : vector<8x128xf32>, vector<128x512xf32>, vector<8x512xf32> -> vector<8x512xf32>
    %266 = arith.addf %264, %265 : vector<8x512xf32>
    %267 = vector.extract_strided_slice %266 {offsets = [0, 0], sizes = [8, 128], strides = [1, 1]} : vector<8x512xf32> to vector<8x128xf32>
    %268 = arith.negf %267 : vector<8x128xf32>
    %269 = math.exp %268 : vector<8x128xf32>
    %cst_41 = arith.constant 1.000000e+00 : f32
    %270 = vector.broadcast %cst_41 : f32 to vector<8x128xf32>
    %271 = arith.addf %270, %269 : vector<8x128xf32>
    %272 = arith.divf %270, %271 : vector<8x128xf32>
    %273 = vector.extract_strided_slice %266 {offsets = [0, 128], sizes = [8, 128], strides = [1, 1]} : vector<8x512xf32> to vector<8x128xf32>
    %274 = arith.negf %273 : vector<8x128xf32>
    %275 = math.exp %274 : vector<8x128xf32>
    %cst_42 = arith.constant 1.000000e+00 : f32
    %276 = vector.broadcast %cst_42 : f32 to vector<8x128xf32>
    %277 = arith.addf %276, %275 : vector<8x128xf32>
    %278 = arith.divf %276, %277 : vector<8x128xf32>
    %279 = vector.extract_strided_slice %266 {offsets = [0, 256], sizes = [8, 128], strides = [1, 1]} : vector<8x512xf32> to vector<8x128xf32>
    %280 = math.tanh %279 : vector<8x128xf32>
    %281 = vector.extract_strided_slice %266 {offsets = [0, 384], sizes = [8, 128], strides = [1, 1]} : vector<8x512xf32> to vector<8x128xf32>
    %282 = arith.negf %281 : vector<8x128xf32>
    %283 = math.exp %282 : vector<8x128xf32>
    %cst_43 = arith.constant 1.000000e+00 : f32
    %284 = vector.broadcast %cst_43 : f32 to vector<8x128xf32>
    %285 = arith.addf %284, %283 : vector<8x128xf32>
    %286 = arith.divf %284, %285 : vector<8x128xf32>
    %287 = arith.mulf %278, %256 : vector<8x128xf32>
    %288 = arith.mulf %272, %280 : vector<8x128xf32>
    %289 = arith.addf %287, %288 : vector<8x128xf32>
    %290 = math.tanh %289 : vector<8x128xf32>
    %291 = arith.mulf %286, %290 : vector<8x128xf32>
    %c0_44 = arith.constant 0 : index
    %c0_45 = arith.constant 0 : index
    %292 = vector.load %arg7[%c0_44, %c0_45] : memref<8x256xf32, #tpu.memory_space<vmem>>, vector<8x128xf32>
    tpu.vector_store %arg7[%c0_44, %c0_45], %291 {strides = array<i32>} : memref<8x256xf32, #tpu.memory_space<vmem>>, vector<8x128xf32>,
    %c0_46 = arith.constant 0 : index
    %c128 = arith.constant 128 : index
    %293 = vector.load %arg7[%c0_46, %c128] : memref<8x256xf32, #tpu.memory_space<vmem>>, vector<8x128xf32>
    tpu.vector_store %arg7[%c0_46, %c128], %28 {strides = array<i32>} : memref<8x256xf32, #tpu.memory_space<vmem>>, vector<8x128xf32>,
    return
  }
  func.func @transform_0(%arg0: i32) -> (i32, i32) {
    %c0_i32 = arith.constant 0 : i32
    %c0_i32_0 = arith.constant 0 : i32
    return %arg0, %c0_i32 : i32, i32
  }
  func.func @transform_1(%arg0: i32) -> (i32, i32) {
    %c0_i32 = arith.constant 0 : i32
    %c0_i32_0 = arith.constant 0 : i32
    %c0_i32_1 = arith.constant 0 : i32
    return %c0_i32, %c0_i32_0 : i32, i32
  }
  func.func @transform_2(%arg0: i32) -> (i32, i32) {
    %c0_i32 = arith.constant 0 : i32
    %c0_i32_0 = arith.constant 0 : i32
    %c0_i32_1 = arith.constant 0 : i32
    return %c0_i32, %c0_i32_0 : i32, i32
  }
  func.func @transform_3(%arg0: i32) -> (i32, i32) {
    %c0_i32 = arith.constant 0 : i32
    %c0_i32_0 = arith.constant 0 : i32
    %c0_i32_1 = arith.constant 0 : i32
    return %c0_i32, %c0_i32_0 : i32, i32
  }
  func.func @transform_4(%arg0: i32) -> (i32, i32) {
    %c0_i32 = arith.constant 0 : i32
    %c0_i32_0 = arith.constant 0 : i32
    %c0_i32_1 = arith.constant 0 : i32
    return %c0_i32, %c0_i32_0 : i32, i32
  }
  func.func @transform_5(%arg0: i32) -> (i32, i32) {
    %c0_i32 = arith.constant 0 : i32
    %c0_i32_0 = arith.constant 0 : i32
    %c0_i32_1 = arith.constant 0 : i32
    return %c0_i32, %c0_i32_0 : i32, i32
  }
  func.func @transform_6(%arg0: i32) -> (i32, i32) {
    %c0_i32 = arith.constant 0 : i32
    %c0_i32_0 = arith.constant 0 : i32
    return %arg0, %c0_i32 : i32, i32
  }
}

</mosaic_0001>

<bundles_post_ra>
// kernel: tpu_custom_call.1
= control target key start
LH: loop header
LB: loop body
LE: loop exit
PB: predicated region body
PF: predicated region fallthrough
CT: control target
= control target key end

     0   :  { %11 = vsyncpa [#allocation3], 0  ;;  %s2814_s0 = inlined_call_operand.hbm [shape: f32[8,8], index: 0, kind: input, shape index: {}]   ;;  %s2815_s1 = inlined_call_operand.hbm [shape: f32[1,512], index: 1, kind: input, shape index: {}]   ;;  %s2816_s2 = inlined_call_operand.hbm [shape: f32[1,512], index: 2, kind: input, shape index: {}]   ;;  %s2817_s3 = inlined_call_operand.hbm [shape: f32[128,512], index: 3, kind: input, shape index: {}]   ;;  %s2818_s4 = inlined_call_operand.hbm [shape: f32[1,512], index: 4, kind: input, shape index: {}]   ;;  %s2819_s5 = inlined_call_operand.vmem [shape: f32[1,512], index: 5, kind: input, shape index: {}]   ;;  %s2820_s6 = inlined_call_operand.hbm [shape: f32[8,256], index: 6, kind: output, shape index: {}]  }
   0x1   :  { %12 = vsyncpa [#allocation6], 0 }
   0x2   :  { %13 = vsyncpa [#allocation9], 0  ;;  %s31_s23 = sshll.u32 %s2815_s1, 4  ;;  %s32_s23 = int_to_ptr.hbm [resolvable:$true] %s31_s23 }
   0x3   :  { %14 = vsyncpa [#allocation4], 0  ;;  %s1862_s24 = smov [#allocation5]   ;;  %s52_s28 = sshll.u32 %s2817_s3, 4  ;;  %s53_s28 = int_to_ptr.hbm [resolvable:$true] %s52_s28 }
   0x4   :  { %s33_s25 = sshll.u32 %s1862_s24, 4  ;;  %s1863_s29 = smov [#allocation8]   ;;  %s34_s25 = int_to_ptr.vmem [resolvable:$true] %s33_s25 }
   0x5   :  { %36 = dma.hbm_to_vmem [thread:$0]  %s32_s23, 64, %s34_s25, [#allocation6]  }
   0x6   :  { %s54_s30 = sshll.u32 %s1863_s29, 4  ;;  %s1864_s7 = smov 512   ;;  %s55_s30 = int_to_ptr.vmem [resolvable:$true] %s54_s30 }
   0x7   :  { %s1865_s8 = smov 32   ;;  %s20_s1 = sshll.u32 %s2814_s0, 4  ;;  %s21_s1 = int_to_ptr.hbm [resolvable:$true] %s20_s1 }
   0x8   :  { %60 = dma.hbm_to_vmem [thread:$0]  %s53_s28, 8192, %s55_s30, [#allocation9], %s1864_s7, %s1864_s7, %s1865_s8  }
   0x9   :  { %s1866_s11 = smov [#allocation2]   ;;  %s42_s3 = sshll.u32 %s2816_s2, 4  ;;  %s43_s3 = int_to_ptr.hbm [resolvable:$true] %s42_s3 }
   0xa   :  { %s22_s12 = sshll.u32 %s1866_s11, 4  ;;  %s1867_s15 = smov [#allocation7]   ;;  %s23_s12 = int_to_ptr.vmem [resolvable:$true] %s22_s12 }
   0xb   :  { %25 = dma.hbm_to_vmem [thread:$0]  %s21_s1, 128, %s23_s12, [#allocation3]  }
   0xc   :  { %s44_s16 = sshll.u32 %s1867_s15, 4  ;;  %s66_s19 = sshll.u32 %s2818_s4, 4  ;;  %s45_s16 = int_to_ptr.vmem [resolvable:$true] %s44_s16  ;;  %s67_s19 = int_to_ptr.hbm [resolvable:$true] %s66_s19 }
   0xd   :  { %47 = dma.hbm_to_vmem [thread:$0]  %s43_s3, 64, %s45_s16, [#allocation6]  }
   0xe   :  { %s1868_s0 = smov [#allocation10]  }
   0xf   :  { %s68_s20 = sshll.u32 %s1868_s0, 4  ;;  %s69_s20 = int_to_ptr.vmem [resolvable:$true] %s68_s20 }
  0x10   :  { %71 = dma.hbm_to_vmem [thread:$0]  %s67_s19, 64, %s69_s20, [#allocation9]  }
  0x11   :  { %1854 = dma.done.wait [#allocation3], 128  }
  0x12   :  { %1855 = vsyncadd [#allocation3], 4294967168 }
  0x13   :  { %1856 = dma.done.wait [#allocation6], 128  }
  0x14   :  { %1857 = vsyncadd [#allocation6], 4294967168 }
  0x15   :  { %1858 = dma.done.wait [#allocation9], 8256  }
  0x16   :  { %1859 = vsyncadd [#allocation9], 4294959040  ;;  %v1869_v0 = vmov 0   ;;  %v1928_v1 = vld [vmem:[#allocation2] sm:$0xff]  ;;  %v1931_v2 = vld [vmem:[#allocation8 + $0x1e0] sm:$0xff]  ;;  %s1441_s24 = sshll.u32 %s2820_s6, 4  ;;  %s1442_s24 = int_to_ptr.hbm [resolvable:$true] %s1441_s24 }
  0x17   :  { %1495 = vset.pattern.permute.xlu0 %v1869_v0  ;;  %2963 = vst [vmem:[#allocation16_spill] sm:$0xff] %v1928_v1  ;;  %v1933_v3 = vld [vmem:[#allocation8 + $0x1e8] sm:$0xff]  ;;  %v1935_v4 = vld [vmem:[#allocation8 + $0x1f0] sm:$0xff]  ;;  %335 = vmatpush.msra.mxu0 %v1931_v2  ;;  %v1939_v5 = vld [vmem:[#allocation8 + $0x1f8] sm:$0xff] }
  0x18   :  { %231 = vperm.xlu0 %1495, %v1928_v1   ;;  %355 = vmatpush.msra.mxu1 %v1933_v3  ;;  %v1943_v6 = vld [vmem:[#allocation8 + $0x1c0] sm:$0xff]  ;;  %v1945_v7 = vld [vmem:[#allocation8 + $0x1c8] sm:$0xff]  ;;  %v1947_v8 = vld [vmem:[#allocation8 + $0x1d0] sm:$0xff] }
  0x19   :  { %375 = vmatpush.msra.mxu2 %v1935_v4  ;;  %395 = vmatpush.msra.mxu3 %v1939_v5  ;;  %2964 = vst [vmem:[#allocation17_spill] sm:$0xff] %v1945_v7  ;;  %v1951_v9 = vld [vmem:[#allocation8 + $0x1d8] sm:$0xff]  ;;  %v1955_v10 = vld [vmem:[#allocation8 + $0x1a0] sm:$0xff]  ;;  %v1957_v11 = vld [vmem:[#allocation8 + $0x1a8] sm:$0xff] }
  0x1a   :  { %336 = vmatpush.msra.mxu0 %v1943_v6  ;;  %356 = vmatpush.msra.mxu1 %v1945_v7  ;;  %2965 = vst [vmem:[#allocation18_spill] sm:$0xff] %v1951_v9  ;;  %v1959_v12 = vld [vmem:[#allocation8 + $0x1b0] sm:$0xff]  ;;  %v1963_v13 = vld [vmem:[#allocation8 + $0x1b8] sm:$0xff]  ;;  %v1967_v14 = vld [vmem:[#allocation8 + $0x180] sm:$0xff] }
  0x1b   :  { %376 = vmatpush.msra.mxu2 %v1947_v8  ;;  %396 = vmatpush.msra.mxu3 %v1951_v9  ;;  %2966 = vst [vmem:[#allocation19_spill] sm:$0xff] %v1955_v10  ;;  %v1969_v15 = vld [vmem:[#allocation8 + $0x188] sm:$0xff]  ;;  %v1971_v16 = vld [vmem:[#allocation8 + $0x190] sm:$0xff]  ;;  %v1975_v17 = vld [vmem:[#allocation8 + $0x198] sm:$0xff] }
  0x1c   :  { %2967 = vst [vmem:[#allocation20_spill] sm:$0xff] %v1957_v11  ;;  %337 = vmatpush.msra.mxu0 %v1955_v10  ;;  %357 = vmatpush.msra.mxu1 %v1957_v11  ;;  %v1979_v18 = vld [vmem:[#allocation8 + $0x160] sm:$0xff]  ;;  %v1981_v19 = vld [vmem:[#allocation8 + $0x168] sm:$0xff]  ;;  %v1983_v20 = vld [vmem:[#allocation8 + $0x170] sm:$0xff] }
  0x1d   :  { %2968 = vst [vmem:[#allocation21_spill] sm:$0xff] %v1963_v13  ;;  %377 = vmatpush.msra.mxu2 %v1959_v12  ;;  %397 = vmatpush.msra.mxu3 %v1963_v13  ;;  %v1985_v21 = vld [vmem:[#allocation5] sm:$0xf]  ;;  %v1993_v23 = vld [vmem:[#allocation8 + $0x140] sm:$0xff]  ;;  %v1995_v24 = vld [vmem:[#allocation8 + $0x148] sm:$0xff] }
  0x1e   :  { %2969 = vst [vmem:[#allocation22_spill] sm:$0xff] %v1971_v16  ;;  %338 = vmatpush.msra.mxu0 %v1967_v14  ;;  %358 = vmatpush.msra.mxu1 %v1969_v15  ;;  %v1989_v22 = vld [vmem:[#allocation8 + $0x178] sm:$0xff]  ;;  %v1997_v25 = vld [vmem:[#allocation8 + $0x150] sm:$0xff]  ;;  %v2006_v28 = vperm.slane %v1985_v21, 0  ;;  %v2009_v29 = vperm.slane %v1985_v21, 1  ;;  %v2012_v30 = vperm.slane %v1985_v21, 3 }
  0x1f   :  { %378 = vmatpush.msra.mxu2 %v1971_v16  ;;  %398 = vmatpush.msra.mxu3 %v1975_v17  ;;  %2970 = vst [vmem:[#allocation23_spill] sm:$0xff] %v1979_v18  ;;  %v1999_v26 = vld [vmem:[#allocation7] sm:$0xf]  ;;  %v2016_v31 = vld [vmem:[#allocation8 + $0x120] sm:$0xff]  ;;  %v2018_v32 = vld [vmem:[#allocation8 + $0x128] sm:$0xff] }
  0x20   :  { %339 = vmatpush.msra.mxu0 %v1979_v18  ;;  %359 = vmatpush.msra.mxu1 %v1981_v19  ;;  %2971 = vst [vmem:[#allocation24_spill] sm:$0xff] %v1989_v22  ;;  %v2003_v27 = vld [vmem:[#allocation8 + $0x158] sm:$0xff]  ;;  %v2020_v33 = vld [vmem:[#allocation8 + $0x130] sm:$0xff]  ;;  %v2027_v35 = vperm.slane %v1999_v26, 0  ;;  %v2030_v36 = vperm.slane %v1999_v26, 1  ;;  %v2033_v37 = vperm.slane %v1999_v26, 3 }
  0x21   :  { %379 = vmatpush.msra.mxu2 %v1983_v20  ;;  %399 = vmatpush.msra.mxu3 %v1989_v22  ;;  %2972 = vst [vmem:[#allocation25_spill] sm:$0xff] %v2006_v28  ;;  %v2024_v34 = vld [vmem:[#allocation8 + $0x138] sm:$0xff]  ;;  %v2037_v38 = vld [vmem:[#allocation8 + $0x100] sm:$0xff]  ;;  %v2039_v39 = vld [vmem:[#allocation8 + $0x108] sm:$0xff] }
  0x22   :  { %340 = vmatpush.msra.mxu0 %v1993_v23  ;;  %360 = vmatpush.msra.mxu1 %v1995_v24  ;;  %2973 = vst [vmem:[#allocation26_spill] sm:$0xff] %v2009_v29  ;;  %v2041_v40 = vld [vmem:[#allocation8 + $0x110] sm:$0xff]  ;;  %v2047_v42 = vld [vmem:[#allocation8 + $0x118] sm:$0xff]  ;;  %v2056_v46 = vld [vmem:[#allocation8 + $0xe0] sm:$0xff] }
  0x23   :  { %2974 = vst [vmem:[#allocation27_spill] sm:$0xff] %v2012_v30  ;;  %380 = vmatpush.msra.mxu2 %v1997_v25  ;;  %400 = vmatpush.msra.mxu3 %v2003_v27  ;;  %v2058_v47 = vld [vmem:[#allocation8 + $0xe8] sm:$0xff]  ;;  %v2060_v48 = vld [vmem:[#allocation8 + $0xf0] sm:$0xff]  ;;  %v2064_v49 = vld [vmem:[#allocation8 + $0xf8] sm:$0xff] }
  0x24   :  { %341 = vmatpush.msra.mxu0 %v2016_v31  ;;  %361 = vmatpush.msra.mxu1 %v2018_v32  ;;  %2975 = vst [vmem:[#allocation28_spill] sm:$0xff] %v2027_v35  ;;  %v2066_v50 = vld [vmem:[#allocation8 + $0xc0] sm:$0xff]  ;;  %v2068_v51 = vld [vmem:[#allocation8 + $0xc8] sm:$0xff]  ;;  %v2074_v55 = vld [vmem:[#allocation8 + $0xd0] sm:$0xff] }
  0x25   :  { %2976 = vst [vmem:[#allocation29_spill] sm:$0xff] %v2030_v36  ;;  %381 = vmatpush.msra.mxu2 %v2020_v33  ;;  %401 = vmatpush.msra.mxu3 %v2024_v34  ;;  %v2076_v56 = vld [vmem:[#allocation8 + $0xd8] sm:$0xff]  ;;  %v2078_v57 = vld [vmem:[#allocation8 + $0xa0] sm:$0xff]  ;;  %v2082_v58 = vld [vmem:[#allocation8 + $0xa8] sm:$0xff] }
  0x26   :  { %2977 = vst [vmem:[#allocation30_spill] sm:$0xff] %v2033_v37  ;;  %342 = vmatpush.msra.mxu0 %v2037_v38  ;;  %362 = vmatpush.msra.mxu1 %v2039_v39  ;;  %v2084_v59 = vld [vmem:[#allocation8 + $0xb0] sm:$0xff]  ;;  %v2086_v60 = vld [vmem:[#allocation8 + $0xb8] sm:$0xff]  ;;  %v2092_v0 = vld [vmem:[#allocation8 + $0x80] sm:$0xff] }
  0x27   :  { %382 = vmatpush.msra.mxu2 %v2041_v40  ;;  %402 = vmatpush.msra.mxu3 %v2047_v42  ;;  %2978 = vst [vmem:[#allocation31_spill] sm:$0xff] %v2076_v56 }
  0x28   :  { %343 = vmatpush.msra.mxu0 %v2056_v46  ;;  %363 = vmatpush.msra.mxu1 %v2058_v47  ;;  %2979 = vst [vmem:[#allocation32_spill] sm:$0xff] %v2078_v57 }
  0x29   :  { %383 = vmatpush.msra.mxu2 %v2060_v48  ;;  %403 = vmatpush.msra.mxu3 %v2064_v49  ;;  %2980 = vst [vmem:[#allocation33_spill] sm:$0xff] %v2082_v58 }
  0x2a   :  { %2981 = vst [vmem:[#allocation34_spill] sm:$0xff] %v2084_v59  ;;  %344 = vmatpush.msra.mxu0 %v2066_v50  ;;  %364 = vmatpush.msra.mxu1 %v2068_v51 }
  0x2b   :  { %2982 = vst [vmem:[#allocation35_spill] sm:$0xff] %v2086_v60  ;;  %384 = vmatpush.msra.mxu2 %v2074_v55  ;;  %404 = vmatpush.msra.mxu3 %v2076_v56 }
  0x2c   :  { %2983 = vst [vmem:[#allocation36_spill] sm:$0xff] %v2092_v0  ;;  %345 = vmatpush.msra.mxu0 %v2078_v57  ;;  %365 = vmatpush.msra.mxu1 %v2082_v58 }
  0x2d   :  { %385 = vmatpush.msra.mxu2 %v2084_v59  ;;  %405 = vmatpush.msra.mxu3 %v2086_v60 }
  0x2e   :  { %346 = vmatpush.msra.mxu0 %v2092_v0 }
  0x8a   :  { %v2043_v41 = vpop.permute.xlu0 %231 }
  0x8b   :  { %v243_v43 = vmul.f32 %v2006_v28, %v2043_v41  ;;  %v244_v44 = vmul.f32 %v2009_v29, %v2043_v41  ;;  %v246_v45 = vmul.f32 %v2012_v30, %v2043_v41  ;;  %v2124_v30 = vld [vmem:[#allocation8 + $0x58] sm:$0xff]  ;;  %v2134_v28 = vld [vmem:[#allocation8 + $0x30] sm:$0xff] }
  0x8c   :  { %2994 = vst [vmem:[#allocation47_spill] sm:$0xff] %v2124_v30 }
  0x8d   :  { %v256_v52 = vadd.f32 %v2027_v35, %v243_v43  ;;  %v257_v53 = vadd.f32 %v2030_v36, %v244_v44  ;;  %v259_v54 = vadd.f32 %v2033_v37, %v246_v45  ;;  %v2094_v43 = vld [vmem:[#allocation8 + $0x88] sm:$0xff]  ;;  %v2098_v44 = vld [vmem:[#allocation8 + $0x90] sm:$0xff]  ;;  %v2100_v45 = vld [vmem:[#allocation8 + $0x98] sm:$0xff]  ;;  %2997 = vst [vmem:[#allocation50_spill] sm:$0xff] %v2134_v28 }
  0x8e   :  { %2984 = vst [vmem:[#allocation37_spill] sm:$0xff] %v2094_v43  ;;  %366 = vmatpush.msra.mxu1 %v2094_v43  ;;  %386 = vmatpush.msra.mxu2 %v2098_v44  ;;  %v2118_v37 = vld [vmem:[#allocation8 + $0x48] sm:$0xff]  ;;  %v2128_v36 = vld [vmem:[#allocation8 + $0x20] sm:$0xff]  ;;  %v2153_v43 = vld [vmem:[#allocation8 + $0x10] sm:$0xff] }
  0x8f   :  { %v1455_v61 = vmul.f32 -1.442695, %v256_v52  ;;  %v1456_v62 = vmul.f32 -1.442695, %v257_v53  ;;  %v1457_v63 = vmul.f32 -1.442695, %v259_v54  ;;  %406 = vmatpush.msra.mxu3 %v2100_v45 }
  0x90   :  { %2985 = vst [vmem:[#allocation38_spill] sm:$0xff] %v2098_v44  ;;  %v2104_v52 = vld [vmem:[#allocation8 + $0x60] sm:$0xff]  ;;  %v2106_v53 = vld [vmem:[#allocation8 + $0x68] sm:$0xff]  ;;  %v2110_v54 = vld [vmem:[#allocation8 + $0x70] sm:$0xff] }
  0x91   :  { %1504 = vpow2.f32 %v1455_v61  ;;  %2986 = vst [vmem:[#allocation39_spill] sm:$0xff] %v2100_v45  ;;  %v2112_v61 = vld [vmem:[#allocation8 + $0x78] sm:$0xff]  ;;  %347 = vmatpush.msra.mxu0 %v2104_v52  ;;  %367 = vmatpush.msra.mxu1 %v2106_v53  ;;  %v2130_v35 = vld [vmem:[#allocation8 + $0x28] sm:$0xff]  ;;  %v2139_v45 = vperm.slane %v1985_v21, 2 }
  0x92   :  { %1506 = vpow2.f32 %v1456_v62  ;;  %2987 = vst [vmem:[#allocation40_spill] sm:$0xff] %v2104_v52  ;;  %v2116_v62 = vld [vmem:[#allocation8 + $0x40] sm:$0xff]  ;;  %387 = vmatpush.msra.mxu2 %v2110_v54  ;;  %407 = vmatpush.msra.mxu3 %v2112_v61  ;;  %v2147_v44 = vld [vmem:[#allocation8 + $0x8] sm:$0xff]  ;;  %v2155_v21 = vld [vmem:[#allocation8 + $0x18] sm:$0xff] }
  0x93   :  { %2988 = vst [vmem:[#allocation41_spill] sm:$0xff] %v2106_v53  ;;  %1508 = vpow2.f32 %v1457_v63  ;;  %v2122_v63 = vld [vmem:[#allocation8 + $0x50] sm:$0xff]  ;;  %348 = vmatpush.msra.mxu0 %v2116_v62  ;;  %368 = vmatpush.msra.mxu1 %v2118_v37  ;;  %v2136_v53 = vld [vmem:[#allocation8 + $0x38] sm:$0xff] }
  0x94   :  { %2989 = vst [vmem:[#allocation42_spill] sm:$0xff] %v2110_v54  ;;  %388 = vmatpush.msra.mxu2 %v2122_v63  ;;  %408 = vmatpush.msra.mxu3 %v2124_v30 }
  0x95   :  { %2990 = vst [vmem:[#allocation43_spill] sm:$0xff] %v2112_v61  ;;  %v2145_v61 = vld [vmem:[#allocation8] sm:$0xff]  ;;  %349 = vmatpush.msra.mxu0 %v2128_v36  ;;  %369 = vmatpush.msra.mxu1 %v2130_v35 }
  0x96   :  { %2991 = vst [vmem:[#allocation44_spill] sm:$0xff] %v2116_v62  ;;  %389 = vmatpush.msra.mxu2 %v2134_v28  ;;  %409 = vmatpush.msra.mxu3 %v2136_v53 }
  0x97   :  { %2992 = vst [vmem:[#allocation45_spill] sm:$0xff] %v2118_v37  ;;  %v1505_v29 = vpop.eup %1504  ;;  %350 = vmatpush.msra.mxu0 %v2145_v61  ;;  %370 = vmatpush.msra.mxu1 %v2147_v44 }
  0x98   :  { %2993 = vst [vmem:[#allocation46_spill] sm:$0xff] %v2122_v63  ;;  %v1507_v52 = vpop.eup %1506  ;;  %v2141_v54 = vadd.f32 1.0, %v1505_v29  ;;  %390 = vmatpush.msra.mxu2 %v2153_v43  ;;  %410 = vmatpush.msra.mxu3 %v2155_v21 }
  0x99   :  { %2995 = vst [vmem:[#allocation48_spill] sm:$0xff] %v2128_v36  ;;  %v1509_v62 = vpop.eup %1508  ;;  %v2149_v37 = vadd.f32 1.0, %v1507_v52  ;;  %v2166_v52 = vperm.slane %v1999_v26, 2  ;;  %494 = vmatpush.msrb.mxu0 %v1931_v2  ;;  %514 = vmatpush.msrb.mxu1 %v1933_v3 }
  0x9a   :  { %2996 = vst [vmem:[#allocation49_spill] sm:$0xff] %v2130_v35  ;;  %1510 = vrcp.f32 %v2141_v54  ;;  %v2161_v29 = vadd.f32 1.0, %v1509_v62  ;;  %v245_v35 = vmul.f32 %v2139_v45, %v2043_v41  ;;  %534 = vmatpush.msrb.mxu2 %v1935_v4  ;;  %554 = vmatpush.msrb.mxu3 %v1939_v5  ;;  %vm269_vm2 = vweird.f32 %v2141_v54 }
  0x9b   :  { %2998 = vst [vmem:[#allocation51_spill] sm:$0xff] %v2136_v53  ;;  %1512 = vrcp.f32 %v2149_v37  ;;  %v1870_v53 = vmov 1   ;;  %495 = vmatpush.msrb.mxu0 %v1943_v6  ;;  %515 = vmatpush.msrb.mxu1 %v1945_v7  ;;  %vm288_vm4 = vweird.f32 %v2149_v37 }
  0x9c   :  { %2999 = vst [vmem:[#allocation52_spill] sm:$0xff] %v2139_v45  ;;  %1514 = vrcp.f32 %v2161_v29  ;;  %1496 = vset.pattern.permute.xlu0 %v1870_v53  ;;  %v258_v41 = vadd.f32 %v2166_v52, %v245_v35  ;;  %535 = vmatpush.msrb.mxu2 %v1947_v8  ;;  %vm308_vm9 = vweird.f32 %v2161_v29 }
  0x9d   :  { %3000 = vst [vmem:[#allocation53_spill] sm:$0xff] %v2145_v61  ;;  %324 = vperm.xlu0 %1496, %v1928_v1   ;;  %555 = vmatpush.msrb.mxu3 %v1951_v9 }
  0x9e   :  { %3001 = vst [vmem:[#allocation54_spill] sm:$0xff] %v2147_v44  ;;  %496 = vmatpush.msrb.mxu0 %v1955_v10  ;;  %516 = vmatpush.msrb.mxu1 %v1957_v11  ;;  %1516 = vtanh.f32 %v258_v41  ;;  %v273_v11 = vand.u32 2147483647, %v2141_v54 }
  0x9f   :  { %3002 = vst [vmem:[#allocation55_spill] sm:$0xff] %v2153_v43  ;;  %536 = vmatpush.msrb.mxu2 %v1959_v12  ;;  %556 = vmatpush.msrb.mxu3 %v1963_v13 }
  0xa0   :  { %3003 = vst [vmem:[#allocation56_spill] sm:$0xff] %v2155_v21  ;;  %v1511_v26 = vpop.eup %1510  ;;  %497 = vmatpush.msrb.mxu0 %v1967_v14  ;;  %517 = vmatpush.msrb.mxu1 %v1969_v15  ;;  %vm274_vm5 = vcmp.eq.f32.partialorder %v273_v11, 8.507059e+37 }
  0xa1   :  { %3004 = vst [vmem:[#allocation57_spill] sm:$0xff] %v2166_v52  ;;  %v1513_v62 = vpop.eup %1512  ;;  %v265_v53 = vmul.f32 %v1511_v26, %v2141_v54  ;;  %v275_v52 = vand.u32 2147483648, %v2141_v54  ;;  %vm270_vm0 = vweird.f32 %v1511_v26  ;;  %537 = vmatpush.msrb.mxu2 %v1971_v16  ;;  %557 = vmatpush.msrb.mxu3 %v1975_v17 }
  0xa2   :  { %v284_v1 = vmul.f32 %v1513_v62, %v2149_v37  ;;  %v2187_v45 = vpop.eup %1514  ;;  %vm289_vm1 = vweird.f32 %v1513_v62  ;;  %498 = vmatpush.msrb.mxu0 %v1979_v18  ;;  %518 = vmatpush.msrb.mxu1 %v1981_v19  ;;  %vm271_vm3 = vmor %vm269_vm2, %vm270_vm0 }
  0xa3   :  { %v266_v35 = vsub.f32 1.0, %v265_v53  ;;  %v304_v9 = vmul.f32 %v2187_v45, %v2161_v29  ;;  %v294_v53 = vand.u32 2147483648, %v2149_v37  ;;  %538 = vmatpush.msrb.mxu2 %v1983_v20  ;;  %558 = vmatpush.msrb.mxu3 %v1989_v22  ;;  %v276_v16 = vor.u32 1.1754944e-38, %v275_v52  ;;  %vm290_vm6 = vmor %vm288_vm4, %vm289_vm1 }
  0xa4   :  { %v285_v7 = vsub.f32 1.0, %v284_v1  ;;  %v292_v1 = vand.u32 2147483647, %v2149_v37  ;;  %499 = vmatpush.msrb.mxu0 %v1993_v23  ;;  %519 = vmatpush.msrb.mxu1 %v1995_v24  ;;  %vm309_vm8 = vweird.f32 %v2187_v45 }
  0xa5   :  { %v267_v10 = vmul.f32 %v1511_v26, %v266_v35  ;;  %v305_v35 = vsub.f32 1.0, %v304_v9  ;;  %539 = vmatpush.msrb.mxu2 %v1997_v25  ;;  %559 = vmatpush.msrb.mxu3 %v2003_v27  ;;  %v1517_v9 = vpop.eup %1516  ;;  %vm310_vm10 = vmor %vm308_vm9, %vm309_vm8 }
  0xa6   :  { %v286_v13 = vmul.f32 %v1513_v62, %v285_v7  ;;  %vm293_vm7 = vcmp.eq.f32.partialorder %v292_v1, 8.507059e+37  ;;  %500 = vmatpush.msrb.mxu0 %v2016_v31  ;;  %520 = vmatpush.msrb.mxu1 %v2018_v32  ;;  %v3005_v1 = vld [vmem:[#allocation37_spill] sm:$0xff] }
  0xa7   :  { %v268_v41 = vadd.f32 %v1511_v26, %v267_v10  ;;  %v295_v10 = vor.u32 1.1754944e-38, %v294_v53  ;;  %v306_v52 = vmul.f32 %v2187_v45, %v305_v35  ;;  %540 = vmatpush.msrb.mxu2 %v2020_v33  ;;  %560 = vmatpush.msrb.mxu3 %v2024_v34 }
  0xa8   :  { %v287_v7 = vadd.f32 %v1513_v62, %v286_v13  ;;  %501 = vmatpush.msrb.mxu0 %v2037_v38  ;;  %521 = vmatpush.msrb.mxu1 %v2039_v39 }
  0xa9   :  { %v272_v18 = vsel %vm271_vm3, %v1511_v26, %v268_v41  ;;  %541 = vmatpush.msrb.mxu2 %v2041_v40  ;;  %561 = vmatpush.msrb.mxu3 %v2047_v42  ;;  %v312_v26 = vand.u32 2147483647, %v2161_v29  ;;  %v3007_v41 = vld [vmem:[#allocation39_spill] sm:$0xff] }
  0xaa   :  { %v277_v54 = vsel %vm274_vm5, %v276_v16, %v272_v18  ;;  %v291_v22 = vsel %vm290_vm6, %v1513_v62, %v287_v7  ;;  %502 = vmatpush.msrb.mxu0 %v2056_v46  ;;  %522 = vmatpush.msrb.mxu1 %v2058_v47  ;;  %v307_v18 = vadd.f32 %v2187_v45, %v306_v52  ;;  %v3013_v52 = vld [vmem:[#allocation45_spill] sm:$0xff] }
  0xab   :  { %v319_v13 = vmul.f32 %v1517_v9, %v277_v54  ;;  %v296_v37 = vsel %vm293_vm7, %v295_v10, %v291_v22  ;;  %542 = vmatpush.msrb.mxu2 %v2060_v48  ;;  %562 = vmatpush.msrb.mxu3 %v2064_v49  ;;  %v314_v22 = vand.u32 2147483648, %v2161_v29  ;;  %vm313_vm11 = vcmp.eq.f32.partialorder %v312_v26, 8.507059e+37  ;;  %v3006_v29 = vld [vmem:[#allocation38_spill] sm:$0xff]  ;;  %v3008_v10 = vld [vmem:[#allocation40_spill] sm:$0xff]  ;;  %v3009_v9 = vld [vmem:[#allocation41_spill] sm:$0xff] }
  0xac   :  { %v318_v11 = vmul.f32 0.0, %v296_v37  ;;  %503 = vmatpush.msrb.mxu0 %v2066_v50  ;;  %523 = vmatpush.msrb.mxu1 %v2068_v51  ;;  %v311_v62 = vsel %vm310_vm10, %v2187_v45, %v307_v18  ;;  %v3010_v54 = vld [vmem:[#allocation42_spill] sm:$0xff]  ;;  %v3012_v37 = vld [vmem:[#allocation44_spill] sm:$0xff]  ;;  %v3015_v18 = vld [vmem:[#allocation51_spill] sm:$0xff] }
  0xad   :  { %543 = vmatpush.msrb.mxu2 %v2074_v55  ;;  %563 = vmatpush.msrb.mxu3 %v2076_v56  ;;  %v315_v53 = vor.u32 1.1754944e-38, %v314_v22  ;;  %v3016_v22 = vld [vmem:[#allocation17_spill] sm:$0xff]  ;;  %v3017_v26 = vld [vmem:[#allocation18_spill] sm:$0xff] }
  0xae   :  { %v2222_v16 = vadd.f32 %v319_v13, %v318_v11  ;;  %504 = vmatpush.msrb.mxu0 %v2078_v57  ;;  %524 = vmatpush.msrb.mxu1 %v2082_v58  ;;  %v3011_v13 = vld [vmem:[#allocation43_spill] sm:$0xff]  ;;  %v3014_v11 = vld [vmem:[#allocation49_spill] sm:$0xff] }
  0xaf   :  { %544 = vmatpush.msrb.mxu2 %v2084_v59  ;;  %564 = vmatpush.msrb.mxu3 %v2086_v60  ;;  %v316_v7 = vsel %vm313_vm11, %v315_v53, %v311_v62  ;;  %v3018_v62 = vld [vmem:[#allocation19_spill] sm:$0xff]  ;;  %v3019_v53 = vld [vmem:[#allocation20_spill] sm:$0xff] }
  0xb0   :  { %1518 = vtanh.f32 %v2222_v16  ;;  %505 = vmatpush.msrb.mxu0 %v2092_v0  ;;  %525 = vmatpush.msrb.mxu1 %v3005_v1 }
  0xb1   :  { %545 = vmatpush.msrb.mxu2 %v3006_v29  ;;  %565 = vmatpush.msrb.mxu3 %v3007_v41 }
  0xb2   :  { %506 = vmatpush.msrb.mxu0 %v3008_v10  ;;  %526 = vmatpush.msrb.mxu1 %v3009_v9 }
  0xb3   :  { %546 = vmatpush.msrb.mxu2 %v3010_v54  ;;  %566 = vmatpush.msrb.mxu3 %v3011_v13 }
  0xb4   :  { %507 = vmatpush.msrb.mxu0 %v3012_v37  ;;  %527 = vmatpush.msrb.mxu1 %v3013_v52 }
  0xb5   :  { %547 = vmatpush.msrb.mxu2 %v2122_v63  ;;  %567 = vmatpush.msrb.mxu3 %v2124_v30 }
  0xb6   :  { %v1519_v35 = vpop.eup %1518  ;;  %508 = vmatpush.msrb.mxu0 %v2128_v36  ;;  %528 = vmatpush.msrb.mxu1 %v3014_v11 }
  0xb7   :  { %v322_v45 = vmul.f32 %v1519_v35, %v316_v7  ;;  %548 = vmatpush.msrb.mxu2 %v2134_v28  ;;  %568 = vmatpush.msrb.mxu3 %v3015_v18  ;;  %v3020_v35 = vld [vmem:[#allocation21_spill] sm:$0xff]  ;;  %v3021_v7 = vld [vmem:[#allocation22_spill] sm:$0xff] }
  0xb8   :  { %509 = vmatpush.msrb.mxu0 %v2145_v61  ;;  %529 = vmatpush.msrb.mxu1 %v2147_v44 }
  0xb9   :  { %351 = vmatmul.f32.vlgmr.msra.gmra.mxu0 %v322_v45  ;;  %371 = vmatmul.f32.vlgmr.msra.gmra.mxu1 %v322_v45 }
  0xba   :  { %391 = vmatmul.f32.vlgmr.msra.gmra.mxu2 %v322_v45  ;;  %411 = vmatmul.f32.vlgmr.msra.gmra.mxu3 %v322_v45  ;;  %v3022_v45 = vld [vmem:[#allocation23_spill] sm:$0xff] }
  0xbb   :  { %549 = vmatpush.msrb.mxu2 %v2153_v43  ;;  %569 = vmatpush.msrb.mxu3 %v2155_v21 }
  0xbc   :  { %653 = vmatpush.msra.mxu0 %v1931_v2  ;;  %673 = vmatpush.msra.mxu1 %v1933_v3 }
  0xbd   :  { %693 = vmatpush.msra.mxu2 %v1935_v4  ;;  %713 = vmatpush.msra.mxu3 %v1939_v5 }
  0xbe   :  { %654 = vmatpush.msra.mxu0 %v1943_v6  ;;  %674 = vmatpush.msra.mxu1 %v3016_v22 }
  0xbf   :  { %694 = vmatpush.msra.mxu2 %v1947_v8  ;;  %714 = vmatpush.msra.mxu3 %v3017_v26 }
  0xc0   :  { %655 = vmatpush.msra.mxu0 %v3018_v62  ;;  %675 = vmatpush.msra.mxu1 %v3019_v53  ;;  %v3023_v62 = vld [vmem:[#allocation24_spill] sm:$0xff] }
  0xc1   :  { %695 = vmatpush.msra.mxu2 %v1959_v12  ;;  %715 = vmatpush.msra.mxu3 %v3020_v35 }
  0xc2   :  { %656 = vmatpush.msra.mxu0 %v1967_v14  ;;  %676 = vmatpush.msra.mxu1 %v1969_v15 }
  0xc3   :  { %696 = vmatpush.msra.mxu2 %v3021_v7  ;;  %716 = vmatpush.msra.mxu3 %v1975_v17 }
  0xc4   :  { %657 = vmatpush.msra.mxu0 %v3022_v45  ;;  %677 = vmatpush.msra.mxu1 %v1981_v19 }
  0xc5   :  { %697 = vmatpush.msra.mxu2 %v1983_v20  ;;  %717 = vmatpush.msra.mxu3 %v3023_v62 }
  0xc6   :  { %658 = vmatpush.msra.mxu0 %v1993_v23  ;;  %678 = vmatpush.msra.mxu1 %v1995_v24 }
  0xc7   :  { %698 = vmatpush.msra.mxu2 %v1997_v25  ;;  %718 = vmatpush.msra.mxu3 %v2003_v27 }
  0xc8   :  { %659 = vmatpush.msra.mxu0 %v2016_v31  ;;  %679 = vmatpush.msra.mxu1 %v2018_v32 }
  0xc9   :  { %699 = vmatpush.msra.mxu2 %v2020_v33  ;;  %719 = vmatpush.msra.mxu3 %v2024_v34 }
  0xca   :  { %660 = vmatpush.msra.mxu0 %v2037_v38  ;;  %680 = vmatpush.msra.mxu1 %v2039_v39 }
  0xcb   :  { %700 = vmatpush.msra.mxu2 %v2041_v40  ;;  %720 = vmatpush.msra.mxu3 %v2047_v42 }
  0xcc   :  { %661 = vmatpush.msra.mxu0 %v2056_v46  ;;  %681 = vmatpush.msra.mxu1 %v2058_v47 }
  0xcd   :  { %701 = vmatpush.msra.mxu2 %v2060_v48  ;;  %721 = vmatpush.msra.mxu3 %v2064_v49 }
  0xce   :  { %662 = vmatpush.msra.mxu0 %v2066_v50  ;;  %682 = vmatpush.msra.mxu1 %v2068_v51 }
  0xcf   :  { %702 = vmatpush.msra.mxu2 %v2074_v55  ;;  %722 = vmatpush.msra.mxu3 %v2076_v56 }
  0xd0   :  { %663 = vmatpush.msra.mxu0 %v2078_v57  ;;  %683 = vmatpush.msra.mxu1 %v2082_v58 }
  0xd1   :  { %703 = vmatpush.msra.mxu2 %v2084_v59  ;;  %723 = vmatpush.msra.mxu3 %v2086_v60 }
  0xd2   :  { %664 = vmatpush.msra.mxu0 %v2092_v0  ;;  %684 = vmatpush.msra.mxu1 %v3005_v1 }
  0xd3   :  { %704 = vmatpush.msra.mxu2 %v3006_v29  ;;  %724 = vmatpush.msra.mxu3 %v3007_v41 }
  0xd4   :  { %665 = vmatpush.msra.mxu0 %v3008_v10  ;;  %685 = vmatpush.msra.mxu1 %v3009_v9 }
  0xd5   :  { %705 = vmatpush.msra.mxu2 %v3010_v54  ;;  %725 = vmatpush.msra.mxu3 %v3011_v13 }
  0xd6   :  { %666 = vmatpush.msra.mxu0 %v3012_v37  ;;  %686 = vmatpush.msra.mxu1 %v3013_v52 }
  0xd7   :  { %706 = vmatpush.msra.mxu2 %v2122_v63  ;;  %726 = vmatpush.msra.mxu3 %v2124_v30  ;;  %v3024_v63 = vld [vmem:[#allocation25_spill] sm:$0xff]  ;;  %v3025_v30 = vld [vmem:[#allocation26_spill] sm:$0xff] }
  0xd8   :  { %667 = vmatpush.msra.mxu0 %v2128_v36  ;;  %687 = vmatpush.msra.mxu1 %v3014_v11  ;;  %v3026_v36 = vld [vmem:[#allocation28_spill] sm:$0xff]  ;;  %v3027_v11 = vld [vmem:[#allocation29_spill] sm:$0xff] }
  0xd9   :  { %707 = vmatpush.msra.mxu2 %v2134_v28  ;;  %727 = vmatpush.msra.mxu3 %v3015_v18 }
  0xda   :  { %668 = vmatpush.msra.mxu0 %v2145_v61  ;;  %688 = vmatpush.msra.mxu1 %v2147_v44  ;;  %v3028_v61 = vld [vmem:[#allocation27_spill] sm:$0xff] }
  0xdb   :  { %708 = vmatpush.msra.mxu2 %v2153_v43  ;;  %728 = vmatpush.msra.mxu3 %v2155_v21  ;;  %v3029_v21 = vld [vmem:[#allocation30_spill] sm:$0xff] }
 0x10f   :  { %v325_v52 = vpop.permute.xlu0 %324 }
 0x110   :  { %v327_v37 = vmul.f32 %v325_v52, %v3024_v63  ;;  %v328_v13 = vmul.f32 %v325_v52, %v3025_v30  ;;  %v330_v29 = vmul.f32 %v325_v52, %v3028_v61 }
 0x112   :  { %v331_v54 = vadd.f32 %v327_v37, %v3026_v36  ;;  %v332_v9 = vadd.f32 %v328_v13, %v3027_v11  ;;  %v334_v43 = vadd.f32 %v330_v29, %v3029_v21  ;;  %v3030_v11 = vld [vmem:[#allocation52_spill] sm:$0xff] }
 0x113   :  { %v329_v36 = vmul.f32 %v325_v52, %v3030_v11 }
 0x136   :  { %v352_v28 = vpop.f32.mrf.mxu0  ;;  %v372_v10 = vpop.f32.mrf.mxu1 }
 0x137   :  { %v415_v18 = vadd.f32 %v352_v28, %v331_v54  ;;  %v416_v41 = vadd.f32 %v372_v10, %v332_v9  ;;  %v1871_v10 = vmov 2   ;;  %v3032_v9 = vld [vmem:[#allocation16_spill] sm:$0xff] }
 0x138   :  { %1497 = vset.pattern.permute.xlu1 %v1871_v10 }
 0x139   :  { %v1458_v44 = vmul.f32 -1.442695, %v415_v18  ;;  %v1459_v1 = vmul.f32 -1.442695, %v416_v41  ;;  %483 = vperm.xlu1 %1497, %v3032_v9  }
 0x13b   :  { %1520 = vpow2.f32 %v1458_v44  ;;  %v3031_v44 = vld [vmem:[#allocation57_spill] sm:$0xff] }
 0x13c   :  { %1522 = vpow2.f32 %v1459_v1  ;;  %v333_v1 = vadd.f32 %v329_v36, %v3031_v44 }
 0x13d   :  { %v412_v0 = vpop.f32.mrf.mxu3  ;;  %v392_v28 = vpop.f32.mrf.mxu2 }
 0x13e   :  { %v418_v63 = vadd.f32 %v412_v0, %v334_v43  ;;  %v417_v43 = vadd.f32 %v392_v28, %v333_v1 }
 0x140   :  { %v1460_v60 = vmul.f32 -1.442695, %v418_v63 }
 0x141   :  { %v1521_v30 = vpop.eup %1520 }
 0x142   :  { %v1523_v59 = vpop.eup %1522  ;;  %v422_v37 = vadd.f32 1.0, %v1521_v30  ;;  %1524 = vpow2.f32 %v1460_v60 }
 0x143   :  { %v441_v13 = vadd.f32 1.0, %v1523_v59 }
 0x144   :  { %1526 = vrcp.f32 %v422_v37  ;;  %v434_v52 = vand.u32 2147483648, %v422_v37  ;;  %v432_v10 = vand.u32 2147483647, %v422_v37  ;;  %vm428_vm14 = vweird.f32 %v422_v37 }
 0x145   :  { %1528 = vrcp.f32 %v441_v13  ;;  %v453_v18 = vand.u32 2147483648, %v441_v13  ;;  %v451_v36 = vand.u32 2147483647, %v441_v13  ;;  %vm447_vm15 = vweird.f32 %v441_v13 }
 0x146   :  { %v435_v28 = vor.u32 1.1754944e-38, %v434_v52  ;;  %vm433_vm2 = vcmp.eq.f32.partialorder %v432_v10, 8.507059e+37 }
 0x147   :  { %vm452_vm3 = vcmp.eq.f32.partialorder %v451_v36, 8.507059e+37 }
 0x148   :  { %v1525_v41 = vpop.eup %1524 }
 0x149   :  { %v461_v29 = vadd.f32 1.0, %v1525_v41 }
 0x14a   :  { %v1527_v0 = vpop.eup %1526 }
 0x14b   :  { %v1529_v63 = vpop.eup %1528  ;;  %v424_v54 = vmul.f32 %v1527_v0, %v422_v37  ;;  %1530 = vrcp.f32 %v461_v29  ;;  %vm429_vm12 = vweird.f32 %v1527_v0  ;;  %vm467_vm5 = vweird.f32 %v461_v29 }
 0x14c   :  { %v443_v30 = vmul.f32 %v1529_v63, %v441_v13  ;;  %1532 = vtanh.f32 %v417_v43  ;;  %vm448_vm13 = vweird.f32 %v1529_v63  ;;  %vm430_vm0 = vmor %vm428_vm14, %vm429_vm12 }
 0x14d   :  { %v425_v59 = vsub.f32 1.0, %v424_v54  ;;  %vm449_vm1 = vmor %vm447_vm15, %vm448_vm13  ;;  %v454_v54 = vor.u32 1.1754944e-38, %v453_v18 }
 0x14e   :  { %v444_v60 = vsub.f32 1.0, %v443_v30 }
 0x14f   :  { %v426_v11 = vmul.f32 %v1527_v0, %v425_v59 }
 0x150   :  { %v445_v21 = vmul.f32 %v1529_v63, %v444_v60 }
 0x151   :  { %v1531_v44 = vpop.eup %1530  ;;  %v427_v9 = vadd.f32 %v1527_v0, %v426_v11 }
 0x152   :  { %v446_v41 = vadd.f32 %v1529_v63, %v445_v21  ;;  %v463_v1 = vmul.f32 %v1531_v44, %v461_v29  ;;  %v1533_v43 = vpop.eup %1532  ;;  %vm468_vm4 = vweird.f32 %v1531_v44  ;;  %v473_v21 = vand.u32 2147483648, %v461_v29 }
 0x153   :  { %v431_v30 = vsel %vm430_vm0, %v1527_v0, %v427_v9  ;;  %v471_v0 = vand.u32 2147483647, %v461_v29  ;;  %vm469_vm6 = vmor %vm467_vm5, %vm468_vm4 }
 0x154   :  { %v436_v61 = vsel %vm433_vm2, %v435_v28, %v431_v30  ;;  %v450_v59 = vsel %vm449_vm1, %v1529_v63, %v446_v41  ;;  %v464_v58 = vsub.f32 1.0, %v463_v1  ;;  %v474_v18 = vor.u32 1.1754944e-38, %v473_v21 }
 0x155   :  { %v455_v60 = vsel %vm452_vm3, %v454_v54, %v450_v59  ;;  %v478_v57 = vmul.f32 %v1533_v43, %v436_v61  ;;  %vm472_vm7 = vcmp.eq.f32.partialorder %v471_v0, 8.507059e+37  ;;  %v3065_v59 = vld [vmem:[#allocation52_spill] sm:$0xff]  ;;  %v3066_v0 = vld [vmem:[#allocation57_spill] sm:$0xff] }
 0x156   :  { %v477_v56 = vmul.f32 %v455_v60, %v2222_v16  ;;  %v465_v11 = vmul.f32 %v1531_v44, %v464_v58  ;;  %v3062_v58 = vld [vmem:[#allocation29_spill] sm:$0xff] }
 0x158   :  { %v2337_v37 = vadd.f32 %v478_v57, %v477_v56  ;;  %v466_v13 = vadd.f32 %v1531_v44, %v465_v11  ;;  %v3033_v56 = vld [vmem:[#allocation19_spill] sm:$0xff] }
 0x15a   :  { %1534 = vtanh.f32 %v2337_v37  ;;  %v470_v52 = vsel %vm469_vm6, %v1531_v44, %v466_v13  ;;  %v3064_v44 = vld [vmem:[#allocation30_spill] sm:$0xff]  ;;  %v1872_v13 = vmov 3  }
 0x15b   :  { %v475_v10 = vsel %vm472_vm7, %v474_v18, %v470_v52  ;;  %1498 = vset.pattern.permute.xlu1 %v1872_v13  ;;  %v2412_v18 = vld [vmem:[#allocation2] sm:$0xff] }
 0x15c   :  { %3067 = vst [vmem:[#allocation17_spill] sm:$0xff] %v2412_v18  ;;  %642 = vperm.xlu1 %1498, %v2412_v18   ;;  %v2449_v13 = vld [vmem:[#allocation8 + $0x1b0] sm:$0xff] }
 0x160   :  { %v1535_v63 = vpop.eup %1534 }
 0x161   :  { %v481_v36 = vmul.f32 %v1535_v63, %v475_v10 }
 0x163   :  { %510 = vmatmul.f32.vlgmr.msrb.gmra.mxu0 %v481_v36  ;;  %530 = vmatmul.f32.vlgmr.msrb.gmra.mxu1 %v481_v36 }
 0x164   :  { %550 = vmatmul.f32.vlgmr.msrb.gmra.mxu2 %v481_v36  ;;  %570 = vmatmul.f32.vlgmr.msrb.gmra.mxu3 %v481_v36 }
 0x165   :  { %812 = vmatpush.msrb.mxu0 %v1931_v2  ;;  %832 = vmatpush.msrb.mxu1 %v1933_v3  ;;  %v3034_v2 = vld [vmem:[#allocation31_spill] sm:$0xff]  ;;  %v3035_v3 = vld [vmem:[#allocation32_spill] sm:$0xff] }
 0x166   :  { %852 = vmatpush.msrb.mxu2 %v1935_v4  ;;  %872 = vmatpush.msrb.mxu3 %v1939_v5  ;;  %v3036_v4 = vld [vmem:[#allocation33_spill] sm:$0xff]  ;;  %v3037_v5 = vld [vmem:[#allocation34_spill] sm:$0xff] }
 0x167   :  { %813 = vmatpush.msrb.mxu0 %v1943_v6  ;;  %833 = vmatpush.msrb.mxu1 %v3016_v22  ;;  %v3038_v6 = vld [vmem:[#allocation35_spill] sm:$0xff] }
 0x168   :  { %853 = vmatpush.msrb.mxu2 %v1947_v8  ;;  %873 = vmatpush.msrb.mxu3 %v3017_v26  ;;  %v3039_v8 = vld [vmem:[#allocation36_spill] sm:$0xff] }
 0x169   :  { %814 = vmatpush.msrb.mxu0 %v3033_v56  ;;  %834 = vmatpush.msrb.mxu1 %v3019_v53  ;;  %v3063_v53 = vld [vmem:[#allocation27_spill] sm:$0xff] }
 0x16a   :  { %854 = vmatpush.msrb.mxu2 %v1959_v12  ;;  %874 = vmatpush.msrb.mxu3 %v3020_v35  ;;  %v3040_v12 = vld [vmem:[#allocation37_spill] sm:$0xff] }
 0x16b   :  { %815 = vmatpush.msrb.mxu0 %v1967_v14  ;;  %835 = vmatpush.msrb.mxu1 %v1969_v15  ;;  %v3041_v14 = vld [vmem:[#allocation38_spill] sm:$0xff]  ;;  %v3042_v15 = vld [vmem:[#allocation39_spill] sm:$0xff] }
 0x16c   :  { %855 = vmatpush.msrb.mxu2 %v3021_v7  ;;  %875 = vmatpush.msrb.mxu3 %v1975_v17  ;;  %v3043_v17 = vld [vmem:[#allocation40_spill] sm:$0xff] }
 0x16d   :  { %816 = vmatpush.msrb.mxu0 %v3022_v45  ;;  %836 = vmatpush.msrb.mxu1 %v1981_v19  ;;  %v3044_v19 = vld [vmem:[#allocation41_spill] sm:$0xff] }
 0x16e   :  { %856 = vmatpush.msrb.mxu2 %v1983_v20  ;;  %876 = vmatpush.msrb.mxu3 %v3023_v62  ;;  %v3045_v20 = vld [vmem:[#allocation42_spill] sm:$0xff] }
 0x16f   :  { %817 = vmatpush.msrb.mxu0 %v1993_v23  ;;  %837 = vmatpush.msrb.mxu1 %v1995_v24  ;;  %v3046_v23 = vld [vmem:[#allocation43_spill] sm:$0xff]  ;;  %v3047_v24 = vld [vmem:[#allocation44_spill] sm:$0xff] }
 0x170   :  { %857 = vmatpush.msrb.mxu2 %v1997_v25  ;;  %877 = vmatpush.msrb.mxu3 %v2003_v27  ;;  %v3048_v25 = vld [vmem:[#allocation45_spill] sm:$0xff]  ;;  %v3049_v27 = vld [vmem:[#allocation46_spill] sm:$0xff] }
 0x171   :  { %818 = vmatpush.msrb.mxu0 %v2016_v31  ;;  %838 = vmatpush.msrb.mxu1 %v2018_v32  ;;  %v3050_v31 = vld [vmem:[#allocation47_spill] sm:$0xff]  ;;  %v3051_v32 = vld [vmem:[#allocation48_spill] sm:$0xff] }
 0x172   :  { %858 = vmatpush.msrb.mxu2 %v2020_v33  ;;  %878 = vmatpush.msrb.mxu3 %v2024_v34  ;;  %v3052_v33 = vld [vmem:[#allocation49_spill] sm:$0xff]  ;;  %v3053_v34 = vld [vmem:[#allocation50_spill] sm:$0xff] }
 0x173   :  { %819 = vmatpush.msrb.mxu0 %v2037_v38  ;;  %839 = vmatpush.msrb.mxu1 %v2039_v39  ;;  %v3054_v38 = vld [vmem:[#allocation51_spill] sm:$0xff]  ;;  %v3055_v39 = vld [vmem:[#allocation53_spill] sm:$0xff] }
 0x174   :  { %859 = vmatpush.msrb.mxu2 %v2041_v40  ;;  %879 = vmatpush.msrb.mxu3 %v2047_v42  ;;  %v3056_v40 = vld [vmem:[#allocation54_spill] sm:$0xff]  ;;  %v3057_v42 = vld [vmem:[#allocation55_spill] sm:$0xff] }
 0x175   :  { %820 = vmatpush.msrb.mxu0 %v2056_v46  ;;  %840 = vmatpush.msrb.mxu1 %v2058_v47  ;;  %v3058_v46 = vld [vmem:[#allocation56_spill] sm:$0xff] }
 0x176   :  { %860 = vmatpush.msrb.mxu2 %v2060_v48  ;;  %880 = vmatpush.msrb.mxu3 %v2064_v49  ;;  %v3059_v48 = vld [vmem:[#allocation25_spill] sm:$0xff] }
 0x177   :  { %821 = vmatpush.msrb.mxu0 %v2066_v50  ;;  %841 = vmatpush.msrb.mxu1 %v2068_v51  ;;  %v3060_v50 = vld [vmem:[#allocation26_spill] sm:$0xff] }
 0x178   :  { %861 = vmatpush.msrb.mxu2 %v2074_v55  ;;  %881 = vmatpush.msrb.mxu3 %v3034_v2  ;;  %v3061_v55 = vld [vmem:[#allocation28_spill] sm:$0xff] }
 0x179   :  { %822 = vmatpush.msrb.mxu0 %v3035_v3  ;;  %842 = vmatpush.msrb.mxu1 %v3036_v4 }
 0x17a   :  { %862 = vmatpush.msrb.mxu2 %v3037_v5  ;;  %882 = vmatpush.msrb.mxu3 %v3038_v6 }
 0x17b   :  { %823 = vmatpush.msrb.mxu0 %v3039_v8  ;;  %843 = vmatpush.msrb.mxu1 %v3040_v12 }
 0x17c   :  { %863 = vmatpush.msrb.mxu2 %v3041_v14  ;;  %883 = vmatpush.msrb.mxu3 %v3042_v15 }
 0x17d   :  { %824 = vmatpush.msrb.mxu0 %v3043_v17  ;;  %844 = vmatpush.msrb.mxu1 %v3044_v19 }
 0x17e   :  { %864 = vmatpush.msrb.mxu2 %v3045_v20  ;;  %884 = vmatpush.msrb.mxu3 %v3046_v23 }
 0x17f   :  { %825 = vmatpush.msrb.mxu0 %v3047_v24  ;;  %845 = vmatpush.msrb.mxu1 %v3048_v25 }
 0x180   :  { %865 = vmatpush.msrb.mxu2 %v3049_v27  ;;  %885 = vmatpush.msrb.mxu3 %v3050_v31 }
 0x181   :  { %826 = vmatpush.msrb.mxu0 %v3051_v32  ;;  %846 = vmatpush.msrb.mxu1 %v3052_v33 }
 0x182   :  { %866 = vmatpush.msrb.mxu2 %v3053_v34  ;;  %886 = vmatpush.msrb.mxu3 %v3054_v38 }
 0x183   :  { %827 = vmatpush.msrb.mxu0 %v3055_v39  ;;  %847 = vmatpush.msrb.mxu1 %v3056_v40 }
 0x184   :  { %867 = vmatpush.msrb.mxu2 %v3057_v42  ;;  %887 = vmatpush.msrb.mxu3 %v3058_v46 }
 0x1ab   :  { %v484_v47 = vpop.permute.xlu1 %483 }
 0x1ac   :  { %v486_v49 = vmul.f32 %v484_v47, %v3059_v48  ;;  %v487_v51 = vmul.f32 %v484_v47, %v3060_v50  ;;  %v489_v35 = vmul.f32 %v484_v47, %v3063_v53  ;;  %v488_v60 = vmul.f32 %v484_v47, %v3065_v59 }
 0x1ae   :  { %v490_v57 = vadd.f32 %v486_v49, %v3061_v55  ;;  %v491_v61 = vadd.f32 %v487_v51, %v3062_v58  ;;  %v493_v29 = vadd.f32 %v489_v35, %v3064_v44  ;;  %v492_v52 = vadd.f32 %v488_v60, %v3066_v0  ;;  %v2443_v60 = vld [vmem:[#allocation8 + $0x1a0] sm:$0xff] }
 0x1e0   :  { %v511_v16 = vpop.f32.mrf.mxu0  ;;  %v531_v22 = vpop.f32.mrf.mxu1 }
 0x1e1   :  { %v574_v26 = vadd.f32 %v511_v16, %v490_v57  ;;  %v575_v62 = vadd.f32 %v531_v22, %v491_v61 }
 0x1e3   :  { %v1461_v7 = vmul.f32 -1.442695, %v574_v26  ;;  %v1462_v45 = vmul.f32 -1.442695, %v575_v62 }
 0x1e5   :  { %1536 = vpow2.f32 %v1461_v7 }
 0x1e6   :  { %1538 = vpow2.f32 %v1462_v45 }
 0x1e7   :  { %v571_v9 = vpop.f32.mrf.mxu3  ;;  %v551_v11 = vpop.f32.mrf.mxu2 }
 0x1e8   :  { %v577_v28 = vadd.f32 %v571_v9, %v493_v29  ;;  %v576_v36 = vadd.f32 %v551_v11, %v492_v52  ;;  %v2422_v9 = vld [vmem:[#allocation8 + $0x1e8] sm:$0xff]  ;;  %v2455_v52 = vld [vmem:[#allocation8 + $0x180] sm:$0xff] }
 0x1e9   :  { %v2446_v11 = vld [vmem:[#allocation8 + $0x1a8] sm:$0xff] }
 0x1ea   :  { %v1463_v41 = vmul.f32 -1.442695, %v577_v28  ;;  %v2425_v28 = vld [vmem:[#allocation8 + $0x1f0] sm:$0xff] }
 0x1eb   :  { %v1537_v1 = vpop.eup %1536 }
 0x1ec   :  { %v1539_v54 = vpop.eup %1538  ;;  %v581_v30 = vadd.f32 1.0, %v1537_v1  ;;  %1540 = vpow2.f32 %v1463_v41  ;;  %v2428_v41 = vld [vmem:[#allocation8 + $0x1f8] sm:$0xff]  ;;  %v2431_v1 = vld [vmem:[#allocation8 + $0x1c0] sm:$0xff] }
 0x1ed   :  { %v600_v43 = vadd.f32 1.0, %v1539_v54  ;;  %v2434_v54 = vld [vmem:[#allocation8 + $0x1c8] sm:$0xff] }
 0x1ee   :  { %1542 = vrcp.f32 %v581_v30  ;;  %v593_v6 = vand.u32 2147483648, %v581_v30  ;;  %v591_v14 = vand.u32 2147483647, %v581_v30  ;;  %vm587_vm10 = vweird.f32 %v581_v30 }
 0x1ef   :  { %1544 = vrcp.f32 %v600_v43  ;;  %v612_v8 = vand.u32 2147483648, %v600_v43  ;;  %v610_v17 = vand.u32 2147483647, %v600_v43  ;;  %vm606_vm11 = vweird.f32 %v600_v43 }
 0x1f0   :  { %v594_v23 = vor.u32 1.1754944e-38, %v593_v6  ;;  %vm592_vm14 = vcmp.eq.f32.partialorder %v591_v14, 8.507059e+37  ;;  %v2482_v6 = vld [vmem:[#allocation8 + $0x148] sm:$0xff]  ;;  %v2491_v14 = vld [vmem:[#allocation8 + $0x120] sm:$0xff] }
 0x1f1   :  { %v613_v27 = vor.u32 1.1754944e-38, %v612_v8  ;;  %vm611_vm15 = vcmp.eq.f32.partialorder %v610_v17, 8.507059e+37  ;;  %v2485_v8 = vld [vmem:[#allocation8 + $0x150] sm:$0xff] }
 0x1f2   :  { %v1541_v21 = vpop.eup %1540  ;;  %v2497_v17 = vld [vmem:[#allocation8 + $0x130] sm:$0xff] }
 0x1f3   :  { %v620_v63 = vadd.f32 1.0, %v1541_v21  ;;  %v2452_v21 = vld [vmem:[#allocation8 + $0x1b8] sm:$0xff] }
 0x1f4   :  { %v1543_v10 = vpop.eup %1542 }
 0x1f5   :  { %v1545_v56 = vpop.eup %1544  ;;  %v583_v2 = vmul.f32 %v1543_v10, %v581_v30  ;;  %1546 = vrcp.f32 %v620_v63  ;;  %vm588_vm8 = vweird.f32 %v1543_v10  ;;  %v632_v22 = vand.u32 2147483648, %v620_v63  ;;  %v2437_v30 = vld [vmem:[#allocation8 + $0x1d0] sm:$0xff] }
 0x1f6   :  { %v602_v3 = vmul.f32 %v1545_v56, %v600_v43  ;;  %1548 = vtanh.f32 %v576_v36  ;;  %vm607_vm9 = vweird.f32 %v1545_v56  ;;  %vm589_vm12 = vmor %vm587_vm10, %vm588_vm8  ;;  %vm626_vm1 = vweird.f32 %v620_v63  ;;  %v2440_v43 = vld [vmem:[#allocation8 + $0x1d8] sm:$0xff] }
 0x1f7   :  { %v584_v4 = vsub.f32 1.0, %v583_v2  ;;  %vm608_vm13 = vmor %vm606_vm11, %vm607_vm9  ;;  %v630_v26 = vand.u32 2147483647, %v620_v63  ;;  %v633_v35 = vor.u32 1.1754944e-38, %v632_v22  ;;  %v2464_v36 = vld [vmem:[#allocation8 + $0x198] sm:$0xff]  ;;  %v2470_v2 = vld [vmem:[#allocation8 + $0x168] sm:$0xff] }
 0x1f8   :  { %v603_v5 = vsub.f32 1.0, %v602_v3  ;;  %v2473_v3 = vld [vmem:[#allocation8 + $0x170] sm:$0xff]  ;;  %v2548_v22 = vld [vmem:[#allocation8 + $0xb8] sm:$0xff] }
 0x1f9   :  { %v585_v12 = vmul.f32 %v1543_v10, %v584_v4  ;;  %vm631_vm3 = vcmp.eq.f32.partialorder %v630_v26, 8.507059e+37  ;;  %v2476_v4 = vld [vmem:[#allocation8 + $0x178] sm:$0xff]  ;;  %3073 = vst [vmem:[#allocation24_spill] sm:$0xff] %v2548_v22  ;;  %v2551_v26 = vld [vmem:[#allocation8 + $0x80] sm:$0xff] }
 0x1fa   :  { %v604_v15 = vmul.f32 %v1545_v56, %v603_v5  ;;  %v2479_v5 = vld [vmem:[#allocation8 + $0x140] sm:$0xff]  ;;  %3074 = vst [vmem:[#allocation16_spill] sm:$0xff] %v2551_v26 }
 0x1fb   :  { %v1547_v19 = vpop.eup %1546  ;;  %v586_v20 = vadd.f32 %v1543_v10, %v585_v12  ;;  %v2488_v12 = vld [vmem:[#allocation8 + $0x158] sm:$0xff] }
 0x1fc   :  { %v605_v24 = vadd.f32 %v1545_v56, %v604_v15  ;;  %v622_v25 = vmul.f32 %v1547_v19, %v620_v63  ;;  %v1549_v32 = vpop.eup %1548  ;;  %vm627_vm0 = vweird.f32 %v1547_v19  ;;  %v2458_v63 = vld [vmem:[#allocation8 + $0x188] sm:$0xff] }
 0x1fd   :  { %v590_v31 = vsel %vm589_vm12, %v1543_v10, %v586_v20  ;;  %vm628_vm2 = vmor %vm626_vm1, %vm627_vm0  ;;  %v2461_v10 = vld [vmem:[#allocation8 + $0x190] sm:$0xff]  ;;  %v2494_v15 = vld [vmem:[#allocation8 + $0x128] sm:$0xff] }
 0x1fe   :  { %v595_v33 = vsel %vm592_vm14, %v594_v23, %v590_v31  ;;  %v609_v34 = vsel %vm608_vm13, %v1545_v56, %v605_v24  ;;  %v623_v38 = vsub.f32 1.0, %v622_v25  ;;  %v2467_v56 = vld [vmem:[#allocation8 + $0x160] sm:$0xff]  ;;  %v2506_v23 = vld [vmem:[#allocation8 + $0x108] sm:$0xff]  ;;  %v2509_v24 = vld [vmem:[#allocation8 + $0x110] sm:$0xff] }
 0x1ff   :  { %v614_v47 = vsel %vm611_vm15, %v613_v27, %v609_v34  ;;  %v637_v49 = vmul.f32 %v1549_v32, %v595_v33  ;;  %v2503_v20 = vld [vmem:[#allocation8 + $0x100] sm:$0xff]  ;;  %v2512_v25 = vld [vmem:[#allocation8 + $0x118] sm:$0xff]  ;;  %v2518_v31 = vld [vmem:[#allocation8 + $0xe8] sm:$0xff] }
 0x200   :  { %v636_v51 = vmul.f32 %v614_v47, %v2337_v37  ;;  %v624_v57 = vmul.f32 %v1547_v19, %v623_v38  ;;  %v2419_v37 = vld [vmem:[#allocation8 + $0x1e0] sm:$0xff]  ;;  %v2521_v32 = vld [vmem:[#allocation8 + $0xf0] sm:$0xff]  ;;  %v2524_v33 = vld [vmem:[#allocation8 + $0xf8] sm:$0xff] }
 0x201   :  { %v2515_v27 = vld [vmem:[#allocation8 + $0xe0] sm:$0xff]  ;;  %v2530_v38 = vld [vmem:[#allocation8 + $0xc8] sm:$0xff]  ;;  %v2533_v47 = vld [vmem:[#allocation8 + $0xd0] sm:$0xff] }
 0x202   :  { %v2416_v61 = vadd.f32 %v637_v49, %v636_v51  ;;  %v625_v16 = vadd.f32 %v1547_v19, %v624_v57  ;;  %v2527_v34 = vld [vmem:[#allocation8 + $0xc0] sm:$0xff]  ;;  %3068 = vst [vmem:[#allocation18_spill] sm:$0xff] %v2533_v47  ;;  %v2536_v49 = vld [vmem:[#allocation8 + $0xd8] sm:$0xff]  ;;  %v2542_v57 = vld [vmem:[#allocation8 + $0xa8] sm:$0xff] }
 0x203   :  { %3069 = vst [vmem:[#allocation20_spill] sm:$0xff] %v2536_v49  ;;  %v2539_v51 = vld [vmem:[#allocation8 + $0xa0] sm:$0xff] }
 0x204   :  { %1550 = vtanh.f32 %v2416_v61  ;;  %v629_v62 = vsel %vm628_vm2, %v1547_v19, %v625_v16  ;;  %v2500_v19 = vld [vmem:[#allocation8 + $0x138] sm:$0xff]  ;;  %3070 = vst [vmem:[#allocation21_spill] sm:$0xff] %v2539_v51  ;;  %v2545_v16 = vld [vmem:[#allocation8 + $0xb0] sm:$0xff] }
 0x205   :  { %v634_v45 = vsel %vm631_vm3, %v633_v35, %v629_v62  ;;  %3071 = vst [vmem:[#allocation22_spill] sm:$0xff] %v2542_v57  ;;  %v2554_v62 = vld [vmem:[#allocation8 + $0x88] sm:$0xff]  ;;  %v2557_v35 = vld [vmem:[#allocation8 + $0x90] sm:$0xff] }
 0x206   :  { %3072 = vst [vmem:[#allocation23_spill] sm:$0xff] %v2545_v16 }
 0x207   :  { %3075 = vst [vmem:[#allocation19_spill] sm:$0xff] %v2554_v62 }
 0x208   :  { %3076 = vst [vmem:[#allocation31_spill] sm:$0xff] %v2557_v35 }
 0x20a   :  { %v1551_v7 = vpop.eup %1550 }
 0x20b   :  { %v640_v29 = vmul.f32 %v1551_v7, %v634_v45  ;;  %v2560_v7 = vld [vmem:[#allocation8 + $0x98] sm:$0xff]  ;;  %v2563_v45 = vld [vmem:[#allocation8 + $0x60] sm:$0xff] }
 0x20c   :  { %3077 = vst [vmem:[#allocation32_spill] sm:$0xff] %v2560_v7 }
 0x20d   :  { %669 = vmatmul.f32.vlgmr.msra.gmra.mxu0 %v640_v29  ;;  %689 = vmatmul.f32.vlgmr.msra.gmra.mxu1 %v640_v29  ;;  %3078 = vst [vmem:[#allocation33_spill] sm:$0xff] %v2563_v45 }
 0x20e   :  { %709 = vmatmul.f32.vlgmr.msra.gmra.mxu2 %v640_v29  ;;  %729 = vmatmul.f32.vlgmr.msra.gmra.mxu3 %v640_v29  ;;  %v2566_v29 = vld [vmem:[#allocation8 + $0x68] sm:$0xff] }
 0x20f   :  { %971 = vmatpush.msra.mxu0 %v2419_v37  ;;  %991 = vmatpush.msra.mxu1 %v2422_v9  ;;  %3079 = vst [vmem:[#allocation34_spill] sm:$0xff] %v2566_v29 }
 0x210   :  { %1011 = vmatpush.msra.mxu2 %v2425_v28  ;;  %1031 = vmatpush.msra.mxu3 %v2428_v41 }
 0x211   :  { %972 = vmatpush.msra.mxu0 %v2431_v1  ;;  %992 = vmatpush.msra.mxu1 %v2434_v54 }
 0x212   :  { %1012 = vmatpush.msra.mxu2 %v2437_v30  ;;  %1032 = vmatpush.msra.mxu3 %v2440_v43 }
 0x213   :  { %973 = vmatpush.msra.mxu0 %v2443_v60  ;;  %993 = vmatpush.msra.mxu1 %v2446_v11 }
 0x214   :  { %1013 = vmatpush.msra.mxu2 %v2449_v13  ;;  %1033 = vmatpush.msra.mxu3 %v2452_v21 }
 0x215   :  { %974 = vmatpush.msra.mxu0 %v2455_v52  ;;  %994 = vmatpush.msra.mxu1 %v2458_v63 }
 0x216   :  { %1014 = vmatpush.msra.mxu2 %v2461_v10  ;;  %1034 = vmatpush.msra.mxu3 %v2464_v36 }
 0x217   :  { %975 = vmatpush.msra.mxu0 %v2467_v56  ;;  %995 = vmatpush.msra.mxu1 %v2470_v2 }
 0x218   :  { %1015 = vmatpush.msra.mxu2 %v2473_v3  ;;  %1035 = vmatpush.msra.mxu3 %v2476_v4 }
 0x219   :  { %976 = vmatpush.msra.mxu0 %v2479_v5  ;;  %996 = vmatpush.msra.mxu1 %v2482_v6 }
 0x21a   :  { %1016 = vmatpush.msra.mxu2 %v2485_v8  ;;  %1036 = vmatpush.msra.mxu3 %v2488_v12 }
 0x21b   :  { %977 = vmatpush.msra.mxu0 %v2491_v14  ;;  %997 = vmatpush.msra.mxu1 %v2494_v15 }
 0x21c   :  { %1017 = vmatpush.msra.mxu2 %v2497_v17  ;;  %1037 = vmatpush.msra.mxu3 %v2500_v19 }
 0x21d   :  { %978 = vmatpush.msra.mxu0 %v2503_v20  ;;  %998 = vmatpush.msra.mxu1 %v2506_v23 }
 0x21e   :  { %1018 = vmatpush.msra.mxu2 %v2509_v24  ;;  %1038 = vmatpush.msra.mxu3 %v2512_v25 }
 0x21f   :  { %979 = vmatpush.msra.mxu0 %v2515_v27  ;;  %999 = vmatpush.msra.mxu1 %v2518_v31 }
 0x220   :  { %1019 = vmatpush.msra.mxu2 %v2521_v32  ;;  %1039 = vmatpush.msra.mxu3 %v2524_v33 }
 0x221   :  { %980 = vmatpush.msra.mxu0 %v2527_v34  ;;  %1000 = vmatpush.msra.mxu1 %v2530_v38 }
 0x222   :  { %1020 = vmatpush.msra.mxu2 %v2533_v47  ;;  %1040 = vmatpush.msra.mxu3 %v2536_v49 }
 0x223   :  { %981 = vmatpush.msra.mxu0 %v2539_v51  ;;  %1001 = vmatpush.msra.mxu1 %v2542_v57 }
 0x224   :  { %1021 = vmatpush.msra.mxu2 %v2545_v16  ;;  %1041 = vmatpush.msra.mxu3 %v2548_v22 }
 0x225   :  { %982 = vmatpush.msra.mxu0 %v2551_v26  ;;  %1002 = vmatpush.msra.mxu1 %v2554_v62  ;;  %v2569_v26 = vld [vmem:[#allocation8 + $0x70] sm:$0xff]  ;;  %v2572_v62 = vld [vmem:[#allocation8 + $0x78] sm:$0xff] }
 0x226   :  { %1022 = vmatpush.msra.mxu2 %v2557_v35  ;;  %1042 = vmatpush.msra.mxu3 %v2560_v7  ;;  %3080 = vst [vmem:[#allocation35_spill] sm:$0xff] %v2569_v26  ;;  %v2575_v35 = vld [vmem:[#allocation8 + $0x40] sm:$0xff]  ;;  %v2578_v7 = vld [vmem:[#allocation8 + $0x48] sm:$0xff] }
 0x227   :  { %983 = vmatpush.msra.mxu0 %v2563_v45  ;;  %1003 = vmatpush.msra.mxu1 %v2566_v29  ;;  %3081 = vst [vmem:[#allocation36_spill] sm:$0xff] %v2572_v62  ;;  %v2581_v45 = vld [vmem:[#allocation8 + $0x50] sm:$0xff]  ;;  %v2584_v29 = vld [vmem:[#allocation8 + $0x58] sm:$0xff] }
 0x228   :  { %1023 = vmatpush.msra.mxu2 %v2569_v26  ;;  %1043 = vmatpush.msra.mxu3 %v2572_v62  ;;  %3082 = vst [vmem:[#allocation37_spill] sm:$0xff] %v2575_v35  ;;  %v2587_v26 = vld [vmem:[#allocation8 + $0x20] sm:$0xff]  ;;  %v2590_v62 = vld [vmem:[#allocation8 + $0x28] sm:$0xff] }
 0x229   :  { %984 = vmatpush.msra.mxu0 %v2575_v35  ;;  %3083 = vst [vmem:[#allocation38_spill] sm:$0xff] %v2578_v7  ;;  %1004 = vmatpush.msra.mxu1 %v2578_v7  ;;  %v2593_v35 = vld [vmem:[#allocation8 + $0x30] sm:$0xff]  ;;  %v2596_v7 = vld [vmem:[#allocation8 + $0x38] sm:$0xff] }
 0x22a   :  { %3084 = vst [vmem:[#allocation39_spill] sm:$0xff] %v2581_v45  ;;  %1024 = vmatpush.msra.mxu2 %v2581_v45  ;;  %1044 = vmatpush.msra.mxu3 %v2584_v29 }
 0x22b   :  { %3085 = vst [vmem:[#allocation40_spill] sm:$0xff] %v2584_v29  ;;  %985 = vmatpush.msra.mxu0 %v2587_v26  ;;  %1005 = vmatpush.msra.mxu1 %v2590_v62 }
 0x22c   :  { %3086 = vst [vmem:[#allocation41_spill] sm:$0xff] %v2587_v26  ;;  %1025 = vmatpush.msra.mxu2 %v2593_v35  ;;  %1045 = vmatpush.msra.mxu3 %v2596_v7  ;;  %v643_v26 = vpop.permute.xlu1 %642 }
 0x22d   :  { %3087 = vst [vmem:[#allocation42_spill] sm:$0xff] %v2590_v62  ;;  %986 = vmatpush.msra.mxu0 %v3055_v39  ;;  %1006 = vmatpush.msra.mxu1 %v3056_v40  ;;  %v645_v29 = vmul.f32 %v643_v26, %v3059_v48  ;;  %v646_v62 = vmul.f32 %v643_v26, %v3060_v50 }
 0x22e   :  { %3088 = vst [vmem:[#allocation43_spill] sm:$0xff] %v2593_v35  ;;  %1026 = vmatpush.msra.mxu2 %v3057_v42  ;;  %1046 = vmatpush.msra.mxu3 %v3058_v46  ;;  %v648_v39 = vmul.f32 %v643_v26, %v3063_v53 }
 0x22f   :  { %3089 = vst [vmem:[#allocation44_spill] sm:$0xff] %v2596_v7  ;;  %v649_v45 = vadd.f32 %v645_v29, %v3061_v55  ;;  %v650_v35 = vadd.f32 %v646_v62, %v3062_v58 }
 0x230   :  { %v652_v42 = vadd.f32 %v648_v39, %v3064_v44 }
 0x28a   :  { %v670_v22 = vpop.f32.mrf.mxu0  ;;  %v690_v16 = vpop.f32.mrf.mxu1 }
 0x28b   :  { %v733_v7 = vadd.f32 %v670_v22, %v649_v45  ;;  %v734_v57 = vadd.f32 %v690_v16, %v650_v35  ;;  %v647_v22 = vmul.f32 %v643_v26, %v3065_v59  ;;  %v1873_v35 = vmov 4  }
 0x28c   :  { %1499 = vset.pattern.permute.xlu2 %v1873_v35 }
 0x28d   :  { %v1464_v40 = vmul.f32 -1.442695, %v733_v7  ;;  %v1465_v51 = vmul.f32 -1.442695, %v734_v57  ;;  %801 = vperm.xlu2 %1499, %v2412_v18  }
 0x28f   :  { %1552 = vpow2.f32 %v1464_v40 }
 0x290   :  { %1554 = vpow2.f32 %v1465_v51  ;;  %v651_v51 = vadd.f32 %v647_v22, %v3066_v0 }
 0x291   :  { %v730_v46 = vpop.f32.mrf.mxu3  ;;  %v710_v16 = vpop.f32.mrf.mxu2 }
 0x292   :  { %v736_v48 = vadd.f32 %v730_v46, %v652_v42 }
 0x294   :  { %v1466_v49 = vmul.f32 -1.442695, %v736_v48  ;;  %v735_v48 = vadd.f32 %v710_v16, %v651_v51 }
 0x295   :  { %v1553_v50 = vpop.eup %1552 }
 0x296   :  { %v1555_v47 = vpop.eup %1554  ;;  %v740_v29 = vadd.f32 1.0, %v1553_v50  ;;  %1556 = vpow2.f32 %v1466_v49 }
 0x297   :  { %v759_v62 = vadd.f32 1.0, %v1555_v47 }
 0x298   :  { %1558 = vrcp.f32 %v740_v29  ;;  %v752_v42 = vand.u32 2147483648, %v740_v29  ;;  %v750_v35 = vand.u32 2147483647, %v740_v29  ;;  %vm746_vm6 = vweird.f32 %v740_v29 }
 0x299   :  { %1560 = vrcp.f32 %v759_v62  ;;  %v771_v26 = vand.u32 2147483648, %v759_v62  ;;  %v769_v22 = vand.u32 2147483647, %v759_v62  ;;  %vm765_vm7 = vweird.f32 %v759_v62 }
 0x29a   :  { %v753_v16 = vor.u32 1.1754944e-38, %v752_v42  ;;  %vm751_vm10 = vcmp.eq.f32.partialorder %v750_v35, 8.507059e+37 }
 0x29b   :  { %vm770_vm11 = vcmp.eq.f32.partialorder %v769_v22, 8.507059e+37  ;;  %v3097_v22 = vld [vmem:[#allocation19_spill] sm:$0xff] }
 0x29c   :  { %v1557_v57 = vpop.eup %1556 }
 0x29d   :  { %v779_v7 = vadd.f32 1.0, %v1557_v57 }
 0x29e   :  { %v1559_v45 = vpop.eup %1558 }
 0x29f   :  { %v1561_v39 = vpop.eup %1560  ;;  %v742_v40 = vmul.f32 %v1559_v45, %v740_v29  ;;  %1562 = vrcp.f32 %v779_v7  ;;  %vm747_vm4 = vweird.f32 %v1559_v45  ;;  %vm785_vm13 = vweird.f32 %v779_v7 }
 0x2a0   :  { %v761_v50 = vmul.f32 %v1561_v39, %v759_v62  ;;  %1564 = vtanh.f32 %v735_v48  ;;  %vm766_vm5 = vweird.f32 %v1561_v39  ;;  %vm748_vm8 = vmor %vm746_vm6, %vm747_vm4 }
 0x2a1   :  { %v743_v47 = vsub.f32 1.0, %v742_v40  ;;  %vm767_vm9 = vmor %vm765_vm7, %vm766_vm5  ;;  %v772_v40 = vor.u32 1.1754944e-38, %v771_v26 }
 0x2a2   :  { %v762_v49 = vsub.f32 1.0, %v761_v50 }
 0x2a3   :  { %v744_v46 = vmul.f32 %v1559_v45, %v743_v47 }
 0x2a4   :  { %v763_v59 = vmul.f32 %v1561_v39, %v762_v49 }
 0x2a5   :  { %v1563_v0 = vpop.eup %1562  ;;  %v745_v18 = vadd.f32 %v1559_v45, %v744_v46 }
 0x2a6   :  { %v764_v57 = vadd.f32 %v1561_v39, %v763_v59  ;;  %v781_v51 = vmul.f32 %v1563_v0, %v779_v7  ;;  %v1565_v48 = vpop.eup %1564  ;;  %vm786_vm12 = vweird.f32 %v1563_v0  ;;  %v791_v59 = vand.u32 2147483648, %v779_v7 }
 0x2a7   :  { %v749_v50 = vsel %vm748_vm8, %v1559_v45, %v745_v18  ;;  %v789_v18 = vand.u32 2147483647, %v779_v7  ;;  %vm787_vm14 = vmor %vm785_vm13, %vm786_vm12  ;;  %v3096_v7 = vld [vmem:[#allocation16_spill] sm:$0xff] }
 0x2a8   :  { %v754_v44 = vsel %vm751_vm10, %v753_v16, %v749_v50  ;;  %v768_v47 = vsel %vm767_vm9, %v1561_v39, %v764_v57  ;;  %v782_v53 = vsub.f32 1.0, %v781_v51  ;;  %v792_v42 = vor.u32 1.1754944e-38, %v791_v59  ;;  %v3098_v16 = vld [vmem:[#allocation31_spill] sm:$0xff]  ;;  %v3099_v57 = vld [vmem:[#allocation32_spill] sm:$0xff]  ;;  %v3100_v51 = vld [vmem:[#allocation33_spill] sm:$0xff] }
 0x2a9   :  { %v773_v49 = vsel %vm770_vm11, %v772_v40, %v768_v47  ;;  %v796_v58 = vmul.f32 %v1565_v48, %v754_v44  ;;  %vm790_vm15 = vcmp.eq.f32.partialorder %v789_v18, 8.507059e+37  ;;  %v3093_v44 = vld [vmem:[#allocation22_spill] sm:$0xff]  ;;  %v3102_v50 = vld [vmem:[#allocation35_spill] sm:$0xff]  ;;  %v3103_v48 = vld [vmem:[#allocation36_spill] sm:$0xff] }
 0x2aa   :  { %v795_v55 = vmul.f32 %v773_v49, %v2416_v61  ;;  %v783_v46 = vmul.f32 %v1563_v0, %v782_v53  ;;  %v3092_v53 = vld [vmem:[#allocation21_spill] sm:$0xff]  ;;  %v3095_v61 = vld [vmem:[#allocation24_spill] sm:$0xff]  ;;  %v3101_v40 = vld [vmem:[#allocation34_spill] sm:$0xff] }
 0x2ab   :  { %v3104_v47 = vld [vmem:[#allocation37_spill] sm:$0xff]  ;;  %v3105_v49 = vld [vmem:[#allocation38_spill] sm:$0xff] }
 0x2ac   :  { %v2613_v29 = vadd.f32 %v796_v58, %v795_v55  ;;  %v784_v62 = vadd.f32 %v1563_v0, %v783_v46  ;;  %v3090_v55 = vld [vmem:[#allocation18_spill] sm:$0xff]  ;;  %v3091_v58 = vld [vmem:[#allocation20_spill] sm:$0xff]  ;;  %v3106_v46 = vld [vmem:[#allocation39_spill] sm:$0xff] }
 0x2ad   :  { %v3108_v59 = vld [vmem:[#allocation41_spill] sm:$0xff]  ;;  %v3109_v18 = vld [vmem:[#allocation42_spill] sm:$0xff] }
 0x2ae   :  { %1566 = vtanh.f32 %v2613_v29  ;;  %v788_v45 = vsel %vm787_vm14, %v1563_v0, %v784_v62  ;;  %v3094_v0 = vld [vmem:[#allocation23_spill] sm:$0xff]  ;;  %v3107_v62 = vld [vmem:[#allocation40_spill] sm:$0xff] }
 0x2af   :  { %v793_v26 = vsel %vm790_vm15, %v792_v42, %v788_v45  ;;  %v3110_v45 = vld [vmem:[#allocation43_spill] sm:$0xff]  ;;  %v3111_v42 = vld [vmem:[#allocation44_spill] sm:$0xff] }
 0x2b4   :  { %v1567_v39 = vpop.eup %1566 }
 0x2b5   :  { %v799_v35 = vmul.f32 %v1567_v39, %v793_v26  ;;  %v2676_v39 = vld [vmem:[#allocation8] sm:$0xff]  ;;  %v2679_v26 = vld [vmem:[#allocation8 + $0x8] sm:$0xff] }
 0x2b6   :  { %3112 = vst [vmem:[#allocation45_spill] sm:$0xff] %v2676_v39 }
 0x2b7   :  { %828 = vmatmul.f32.vlgmr.msrb.gmra.mxu0 %v799_v35  ;;  %848 = vmatmul.f32.vlgmr.msrb.gmra.mxu1 %v799_v35  ;;  %3113 = vst [vmem:[#allocation46_spill] sm:$0xff] %v2679_v26 }
 0x2b8   :  { %868 = vmatmul.f32.vlgmr.msrb.gmra.mxu2 %v799_v35  ;;  %888 = vmatmul.f32.vlgmr.msrb.gmra.mxu3 %v799_v35  ;;  %v2682_v35 = vld [vmem:[#allocation8 + $0x10] sm:$0xff] }
 0x2b9   :  { %1130 = vmatpush.msrb.mxu0 %v2419_v37  ;;  %1150 = vmatpush.msrb.mxu1 %v2422_v9  ;;  %3114 = vst [vmem:[#allocation47_spill] sm:$0xff] %v2682_v35 }
 0x2ba   :  { %1170 = vmatpush.msrb.mxu2 %v2425_v28  ;;  %1190 = vmatpush.msrb.mxu3 %v2428_v41 }
 0x2bb   :  { %1131 = vmatpush.msrb.mxu0 %v2431_v1  ;;  %1151 = vmatpush.msrb.mxu1 %v2434_v54 }
 0x2bc   :  { %1171 = vmatpush.msrb.mxu2 %v2437_v30  ;;  %1191 = vmatpush.msrb.mxu3 %v2440_v43 }
 0x2bd   :  { %1132 = vmatpush.msrb.mxu0 %v2443_v60  ;;  %1152 = vmatpush.msrb.mxu1 %v2446_v11 }
 0x2be   :  { %1172 = vmatpush.msrb.mxu2 %v2449_v13  ;;  %1192 = vmatpush.msrb.mxu3 %v2452_v21 }
 0x2bf   :  { %1133 = vmatpush.msrb.mxu0 %v2455_v52  ;;  %1153 = vmatpush.msrb.mxu1 %v2458_v63 }
 0x2c0   :  { %1173 = vmatpush.msrb.mxu2 %v2461_v10  ;;  %1193 = vmatpush.msrb.mxu3 %v2464_v36 }
 0x2c1   :  { %1134 = vmatpush.msrb.mxu0 %v2467_v56  ;;  %1154 = vmatpush.msrb.mxu1 %v2470_v2 }
 0x2c2   :  { %1174 = vmatpush.msrb.mxu2 %v2473_v3  ;;  %1194 = vmatpush.msrb.mxu3 %v2476_v4 }
 0x2c3   :  { %1135 = vmatpush.msrb.mxu0 %v2479_v5  ;;  %1155 = vmatpush.msrb.mxu1 %v2482_v6 }
 0x2c4   :  { %1175 = vmatpush.msrb.mxu2 %v2485_v8  ;;  %1195 = vmatpush.msrb.mxu3 %v2488_v12 }
 0x2c5   :  { %1136 = vmatpush.msrb.mxu0 %v2491_v14  ;;  %1156 = vmatpush.msrb.mxu1 %v2494_v15 }
 0x2c6   :  { %1176 = vmatpush.msrb.mxu2 %v2497_v17  ;;  %1196 = vmatpush.msrb.mxu3 %v2500_v19 }
 0x2c7   :  { %1137 = vmatpush.msrb.mxu0 %v2503_v20  ;;  %1157 = vmatpush.msrb.mxu1 %v2506_v23 }
 0x2c8   :  { %1177 = vmatpush.msrb.mxu2 %v2509_v24  ;;  %1197 = vmatpush.msrb.mxu3 %v2512_v25 }
 0x2c9   :  { %1138 = vmatpush.msrb.mxu0 %v2515_v27  ;;  %1158 = vmatpush.msrb.mxu1 %v2518_v31 }
 0x2ca   :  { %1178 = vmatpush.msrb.mxu2 %v2521_v32  ;;  %1198 = vmatpush.msrb.mxu3 %v2524_v33 }
 0x2cb   :  { %1139 = vmatpush.msrb.mxu0 %v2527_v34  ;;  %1159 = vmatpush.msrb.mxu1 %v2530_v38 }
 0x2cc   :  { %1179 = vmatpush.msrb.mxu2 %v3090_v55  ;;  %1199 = vmatpush.msrb.mxu3 %v3091_v58 }
 0x2cd   :  { %1140 = vmatpush.msrb.mxu0 %v3092_v53  ;;  %1160 = vmatpush.msrb.mxu1 %v3093_v44 }
 0x2ce   :  { %1180 = vmatpush.msrb.mxu2 %v3094_v0  ;;  %1200 = vmatpush.msrb.mxu3 %v3095_v61 }
 0x2cf   :  { %1141 = vmatpush.msrb.mxu0 %v3096_v7  ;;  %1161 = vmatpush.msrb.mxu1 %v3097_v22 }
 0x2d0   :  { %1181 = vmatpush.msrb.mxu2 %v3098_v16  ;;  %1201 = vmatpush.msrb.mxu3 %v3099_v57  ;;  %v3120_v57 = vld [vmem:[#allocation27_spill] sm:$0xff] }
 0x2d1   :  { %1142 = vmatpush.msrb.mxu0 %v3100_v51  ;;  %1162 = vmatpush.msrb.mxu1 %v3101_v40 }
 0x2d2   :  { %1182 = vmatpush.msrb.mxu2 %v3102_v50  ;;  %1202 = vmatpush.msrb.mxu3 %v3103_v48 }
 0x2d3   :  { %1143 = vmatpush.msrb.mxu0 %v3104_v47  ;;  %1163 = vmatpush.msrb.mxu1 %v3105_v49  ;;  %v3118_v49 = vld [vmem:[#allocation28_spill] sm:$0xff] }
 0x2d4   :  { %1183 = vmatpush.msrb.mxu2 %v3106_v46  ;;  %1203 = vmatpush.msrb.mxu3 %v3107_v62  ;;  %v2685_v62 = vld [vmem:[#allocation8 + $0x18] sm:$0xff] }
 0x2d5   :  { %1144 = vmatpush.msrb.mxu0 %v3108_v59  ;;  %1164 = vmatpush.msrb.mxu1 %v3109_v18  ;;  %3115 = vst [vmem:[#allocation48_spill] sm:$0xff] %v2685_v62 }
 0x2d6   :  { %1184 = vmatpush.msrb.mxu2 %v3110_v45  ;;  %1204 = vmatpush.msrb.mxu3 %v3111_v42  ;;  %v3116_v45 = vld [vmem:[#allocation25_spill] sm:$0xff]  ;;  %v3117_v42 = vld [vmem:[#allocation26_spill] sm:$0xff] }
 0x2d7   :  { %1145 = vmatpush.msrb.mxu0 %v2676_v39  ;;  %1165 = vmatpush.msrb.mxu1 %v2679_v26  ;;  %v3119_v39 = vld [vmem:[#allocation29_spill] sm:$0xff] }
 0x2d8   :  { %1185 = vmatpush.msrb.mxu2 %v2682_v35  ;;  %1205 = vmatpush.msrb.mxu3 %v2685_v62  ;;  %v3121_v62 = vld [vmem:[#allocation30_spill] sm:$0xff] }
 0x2e7   :  { %v802_v18 = vpop.permute.xlu2 %801 }
 0x2e8   :  { %v804_v59 = vmul.f32 %v802_v18, %v3116_v45  ;;  %v805_v46 = vmul.f32 %v802_v18, %v3117_v42  ;;  %v807_v16 = vmul.f32 %v802_v18, %v3120_v57 }
 0x2ea   :  { %v808_v47 = vadd.f32 %v804_v59, %v3118_v49  ;;  %v809_v48 = vadd.f32 %v805_v46, %v3119_v39  ;;  %v811_v7 = vadd.f32 %v807_v16, %v3121_v62  ;;  %v3122_v39 = vld [vmem:[#allocation52_spill] sm:$0xff] }
 0x334   :  { %v829_v50 = vpop.f32.mrf.mxu0  ;;  %v849_v40 = vpop.f32.mrf.mxu1 }
 0x335   :  { %v892_v26 = vadd.f32 %v829_v50, %v808_v47  ;;  %v893_v51 = vadd.f32 %v849_v40, %v809_v48  ;;  %v806_v50 = vmul.f32 %v802_v18, %v3122_v39  ;;  %v1874_v48 = vmov 5   ;;  %v3123_v47 = vld [vmem:[#allocation57_spill] sm:$0xff] }
 0x336   :  { %1500 = vset.pattern.permute.xlu2 %v1874_v48 }
 0x337   :  { %v1467_v35 = vmul.f32 -1.442695, %v892_v26  ;;  %v1468_v22 = vmul.f32 -1.442695, %v893_v51  ;;  %v3124_v26 = vld [vmem:[#allocation17_spill] sm:$0xff] }
 0x338   :  { %960 = vperm.xlu2 %1500, %v3124_v26  }
 0x339   :  { %1568 = vpow2.f32 %v1467_v35 }
 0x33a   :  { %1570 = vpow2.f32 %v1468_v22  ;;  %v810_v22 = vadd.f32 %v806_v50, %v3123_v47 }
 0x33b   :  { %v889_v61 = vpop.f32.mrf.mxu3  ;;  %v869_v40 = vpop.f32.mrf.mxu2 }
 0x33c   :  { %v895_v45 = vadd.f32 %v889_v61, %v811_v7  ;;  %v894_v7 = vadd.f32 %v869_v40, %v810_v22 }
 0x33e   :  { %v1469_v0 = vmul.f32 -1.442695, %v895_v45 }
 0x33f   :  { %v1569_v42 = vpop.eup %1568 }
 0x340   :  { %v1571_v44 = vpop.eup %1570  ;;  %v899_v59 = vadd.f32 1.0, %v1569_v42  ;;  %1572 = vpow2.f32 %v1469_v0 }
 0x341   :  { %v918_v46 = vadd.f32 1.0, %v1571_v44 }
 0x342   :  { %1574 = vrcp.f32 %v899_v59  ;;  %v911_v62 = vand.u32 2147483648, %v899_v59  ;;  %v909_v48 = vand.u32 2147483647, %v899_v59  ;;  %vm905_vm2 = vweird.f32 %v899_v59 }
 0x343   :  { %1576 = vrcp.f32 %v918_v46  ;;  %v930_v18 = vand.u32 2147483648, %v918_v46  ;;  %v928_v50 = vand.u32 2147483647, %v918_v46  ;;  %vm924_vm3 = vweird.f32 %v918_v46 }
 0x344   :  { %v912_v40 = vor.u32 1.1754944e-38, %v911_v62  ;;  %vm910_vm6 = vcmp.eq.f32.partialorder %v909_v48, 8.507059e+37 }
 0x345   :  { %vm929_vm7 = vcmp.eq.f32.partialorder %v928_v50, 8.507059e+37 }
 0x346   :  { %v1573_v51 = vpop.eup %1572 }
 0x347   :  { %v938_v16 = vadd.f32 1.0, %v1573_v51 }
 0x348   :  { %v1575_v61 = vpop.eup %1574 }
 0x349   :  { %v1577_v45 = vpop.eup %1576  ;;  %v901_v35 = vmul.f32 %v1575_v61, %v899_v59  ;;  %1578 = vrcp.f32 %v938_v16  ;;  %vm906_vm0 = vweird.f32 %v1575_v61  ;;  %vm944_vm9 = vweird.f32 %v938_v16 }
 0x34a   :  { %v920_v0 = vmul.f32 %v1577_v45, %v918_v46  ;;  %1580 = vtanh.f32 %v894_v7  ;;  %vm925_vm1 = vweird.f32 %v1577_v45  ;;  %vm907_vm4 = vmor %vm905_vm2, %vm906_vm0  ;;  %v948_v62 = vand.u32 2147483647, %v938_v16 }
 0x34b   :  { %v902_v44 = vsub.f32 1.0, %v901_v35  ;;  %vm926_vm5 = vmor %vm924_vm3, %vm925_vm1  ;;  %v931_v35 = vor.u32 1.1754944e-38, %v930_v18 }
 0x34c   :  { %v921_v42 = vsub.f32 1.0, %v920_v0  ;;  %vm949_vm11 = vcmp.eq.f32.partialorder %v948_v62, 8.507059e+37  ;;  %v3158_v62 = vld [vmem:[#allocation57_spill] sm:$0xff] }
 0x34d   :  { %v903_v39 = vmul.f32 %v1575_v61, %v902_v44 }
 0x34e   :  { %v922_v57 = vmul.f32 %v1577_v45, %v921_v42 }
 0x34f   :  { %v1579_v47 = vpop.eup %1578  ;;  %v904_v26 = vadd.f32 %v1575_v61, %v903_v39 }
 0x350   :  { %v923_v51 = vadd.f32 %v1577_v45, %v922_v57  ;;  %v940_v22 = vmul.f32 %v1579_v47, %v938_v16  ;;  %v1581_v7 = vpop.eup %1580  ;;  %vm945_vm8 = vweird.f32 %v1579_v47  ;;  %v950_v57 = vand.u32 2147483648, %v938_v16 }
 0x351   :  { %v908_v0 = vsel %vm907_vm4, %v1575_v61, %v904_v26  ;;  %vm946_vm10 = vmor %vm944_vm9, %vm945_vm8 }
 0x352   :  { %v913_v49 = vsel %vm910_vm6, %v912_v40, %v908_v0  ;;  %v927_v44 = vsel %vm926_vm5, %v1577_v45, %v923_v51  ;;  %v941_v53 = vsub.f32 1.0, %v940_v22  ;;  %v951_v61 = vor.u32 1.1754944e-38, %v950_v57 }
 0x353   :  { %v932_v42 = vsel %vm929_vm7, %v931_v35, %v927_v44  ;;  %v955_v58 = vmul.f32 %v1581_v7, %v913_v49  ;;  %v3157_v44 = vld [vmem:[#allocation52_spill] sm:$0xff] }
 0x354   :  { %v954_v55 = vmul.f32 %v932_v42, %v2613_v29  ;;  %v942_v39 = vmul.f32 %v1579_v47, %v941_v53 }
 0x356   :  { %v2698_v59 = vadd.f32 %v955_v58, %v954_v55  ;;  %v943_v46 = vadd.f32 %v1579_v47, %v942_v39  ;;  %v3155_v55 = vld [vmem:[#allocation27_spill] sm:$0xff] }
 0x358   :  { %1582 = vtanh.f32 %v2698_v59  ;;  %v947_v26 = vsel %vm946_vm10, %v1579_v47, %v943_v46  ;;  %v3156_v47 = vld [vmem:[#allocation30_spill] sm:$0xff]  ;;  %v1875_v46 = vmov 6  }
 0x359   :  { %v952_v18 = vsel %vm949_vm11, %v951_v61, %v947_v26  ;;  %1501 = vset.pattern.permute.xlu1 %v1875_v46  ;;  %1503 = vset.pattern.permute.xlu0 %v1875_v46  ;;  %v3159_v61 = vld [vmem:[#allocation17_spill] sm:$0xff] }
 0x35a   :  { %1119 = vperm.xlu1 %1501, %v3159_v61  }
 0x35e   :  { %v1583_v45 = vpop.eup %1582 }
 0x35f   :  { %v958_v48 = vmul.f32 %v1583_v45, %v952_v18 }
 0x361   :  { %987 = vmatmul.f32.vlgmr.msra.gmra.mxu0 %v958_v48  ;;  %1007 = vmatmul.f32.vlgmr.msra.gmra.mxu1 %v958_v48 }
 0x362   :  { %1027 = vmatmul.f32.vlgmr.msra.gmra.mxu2 %v958_v48  ;;  %1047 = vmatmul.f32.vlgmr.msra.gmra.mxu3 %v958_v48 }
 0x363   :  { %1285 = vmatpush.msra.mxu0 %v2419_v37  ;;  %1305 = vmatpush.msra.mxu1 %v2422_v9  ;;  %v3125_v37 = vld [vmem:[#allocation18_spill] sm:$0xff]  ;;  %v3126_v9 = vld [vmem:[#allocation20_spill] sm:$0xff] }
 0x364   :  { %1325 = vmatpush.msra.mxu2 %v2425_v28  ;;  %1345 = vmatpush.msra.mxu3 %v2428_v41  ;;  %v3127_v28 = vld [vmem:[#allocation21_spill] sm:$0xff]  ;;  %v3128_v41 = vld [vmem:[#allocation22_spill] sm:$0xff] }
 0x365   :  { %1286 = vmatpush.msra.mxu0 %v2431_v1  ;;  %1306 = vmatpush.msra.mxu1 %v2434_v54  ;;  %v3129_v1 = vld [vmem:[#allocation23_spill] sm:$0xff]  ;;  %v3130_v54 = vld [vmem:[#allocation24_spill] sm:$0xff] }
 0x366   :  { %1326 = vmatpush.msra.mxu2 %v2437_v30  ;;  %1346 = vmatpush.msra.mxu3 %v2440_v43  ;;  %v3131_v30 = vld [vmem:[#allocation16_spill] sm:$0xff]  ;;  %v3132_v43 = vld [vmem:[#allocation19_spill] sm:$0xff] }
 0x367   :  { %1287 = vmatpush.msra.mxu0 %v2443_v60  ;;  %1307 = vmatpush.msra.mxu1 %v2446_v11  ;;  %v3133_v60 = vld [vmem:[#allocation31_spill] sm:$0xff]  ;;  %v3134_v11 = vld [vmem:[#allocation32_spill] sm:$0xff] }
 0x368   :  { %1327 = vmatpush.msra.mxu2 %v2449_v13  ;;  %1347 = vmatpush.msra.mxu3 %v2452_v21  ;;  %v3135_v13 = vld [vmem:[#allocation33_spill] sm:$0xff]  ;;  %v3136_v21 = vld [vmem:[#allocation34_spill] sm:$0xff] }
 0x369   :  { %1288 = vmatpush.msra.mxu0 %v2455_v52  ;;  %1308 = vmatpush.msra.mxu1 %v2458_v63  ;;  %v3137_v52 = vld [vmem:[#allocation35_spill] sm:$0xff]  ;;  %v3138_v63 = vld [vmem:[#allocation36_spill] sm:$0xff] }
 0x36a   :  { %1328 = vmatpush.msra.mxu2 %v2461_v10  ;;  %1348 = vmatpush.msra.mxu3 %v2464_v36  ;;  %v3139_v10 = vld [vmem:[#allocation37_spill] sm:$0xff]  ;;  %v3140_v36 = vld [vmem:[#allocation38_spill] sm:$0xff] }
 0x36b   :  { %1289 = vmatpush.msra.mxu0 %v2467_v56  ;;  %1309 = vmatpush.msra.mxu1 %v2470_v2  ;;  %v3141_v56 = vld [vmem:[#allocation39_spill] sm:$0xff]  ;;  %v3142_v2 = vld [vmem:[#allocation40_spill] sm:$0xff] }
 0x36c   :  { %1329 = vmatpush.msra.mxu2 %v2473_v3  ;;  %1349 = vmatpush.msra.mxu3 %v2476_v4  ;;  %v3143_v3 = vld [vmem:[#allocation41_spill] sm:$0xff]  ;;  %v3144_v4 = vld [vmem:[#allocation42_spill] sm:$0xff] }
 0x36d   :  { %1290 = vmatpush.msra.mxu0 %v2479_v5  ;;  %1310 = vmatpush.msra.mxu1 %v2482_v6  ;;  %v3145_v5 = vld [vmem:[#allocation43_spill] sm:$0xff]  ;;  %v3146_v6 = vld [vmem:[#allocation44_spill] sm:$0xff] }
 0x36e   :  { %1330 = vmatpush.msra.mxu2 %v2485_v8  ;;  %1350 = vmatpush.msra.mxu3 %v2488_v12  ;;  %v3147_v8 = vld [vmem:[#allocation45_spill] sm:$0xff]  ;;  %v3148_v12 = vld [vmem:[#allocation46_spill] sm:$0xff] }
 0x36f   :  { %1291 = vmatpush.msra.mxu0 %v2491_v14  ;;  %1311 = vmatpush.msra.mxu1 %v2494_v15  ;;  %v3149_v14 = vld [vmem:[#allocation47_spill] sm:$0xff]  ;;  %v3150_v15 = vld [vmem:[#allocation48_spill] sm:$0xff] }
 0x370   :  { %1331 = vmatpush.msra.mxu2 %v2497_v17  ;;  %1351 = vmatpush.msra.mxu3 %v2500_v19  ;;  %v3151_v19 = vld [vmem:[#allocation25_spill] sm:$0xff] }
 0x371   :  { %1292 = vmatpush.msra.mxu0 %v2503_v20  ;;  %1312 = vmatpush.msra.mxu1 %v2506_v23  ;;  %v3152_v23 = vld [vmem:[#allocation26_spill] sm:$0xff] }
 0x372   :  { %1332 = vmatpush.msra.mxu2 %v2509_v24  ;;  %1352 = vmatpush.msra.mxu3 %v2512_v25  ;;  %v3153_v25 = vld [vmem:[#allocation28_spill] sm:$0xff] }
 0x373   :  { %1293 = vmatpush.msra.mxu0 %v2515_v27  ;;  %1313 = vmatpush.msra.mxu1 %v2518_v31  ;;  %v3154_v31 = vld [vmem:[#allocation29_spill] sm:$0xff] }
 0x374   :  { %1333 = vmatpush.msra.mxu2 %v2521_v32  ;;  %1353 = vmatpush.msra.mxu3 %v2524_v33 }
 0x375   :  { %1294 = vmatpush.msra.mxu0 %v2527_v34  ;;  %1314 = vmatpush.msra.mxu1 %v2530_v38 }
 0x376   :  { %1334 = vmatpush.msra.mxu2 %v3125_v37  ;;  %1354 = vmatpush.msra.mxu3 %v3126_v9 }
 0x377   :  { %1295 = vmatpush.msra.mxu0 %v3127_v28  ;;  %1315 = vmatpush.msra.mxu1 %v3128_v41 }
 0x378   :  { %1335 = vmatpush.msra.mxu2 %v3129_v1  ;;  %1355 = vmatpush.msra.mxu3 %v3130_v54 }
 0x379   :  { %1296 = vmatpush.msra.mxu0 %v3131_v30  ;;  %1316 = vmatpush.msra.mxu1 %v3132_v43 }
 0x37a   :  { %1336 = vmatpush.msra.mxu2 %v3133_v60  ;;  %1356 = vmatpush.msra.mxu3 %v3134_v11 }
 0x37b   :  { %1297 = vmatpush.msra.mxu0 %v3135_v13  ;;  %1317 = vmatpush.msra.mxu1 %v3136_v21 }
 0x37c   :  { %1337 = vmatpush.msra.mxu2 %v3137_v52  ;;  %1357 = vmatpush.msra.mxu3 %v3138_v63 }
 0x37d   :  { %1298 = vmatpush.msra.mxu0 %v3139_v10  ;;  %1318 = vmatpush.msra.mxu1 %v3140_v36 }
 0x37e   :  { %1338 = vmatpush.msra.mxu2 %v3141_v56  ;;  %1358 = vmatpush.msra.mxu3 %v3142_v2 }
 0x37f   :  { %1299 = vmatpush.msra.mxu0 %v3143_v3  ;;  %1319 = vmatpush.msra.mxu1 %v3144_v4 }
 0x380   :  { %1339 = vmatpush.msra.mxu2 %v3145_v5  ;;  %1359 = vmatpush.msra.mxu3 %v3146_v6 }
 0x381   :  { %1300 = vmatpush.msra.mxu0 %v3147_v8  ;;  %1320 = vmatpush.msra.mxu1 %v3148_v12 }
 0x382   :  { %1340 = vmatpush.msra.mxu2 %v3149_v14  ;;  %1360 = vmatpush.msra.mxu3 %v3150_v15 }
 0x392   :  { %v961_v17 = vpop.permute.xlu2 %960 }
 0x393   :  { %v963_v20 = vmul.f32 %v961_v17, %v3151_v19  ;;  %v964_v24 = vmul.f32 %v961_v17, %v3152_v23  ;;  %v966_v58 = vmul.f32 %v961_v17, %v3155_v55  ;;  %v965_v42 = vmul.f32 %v961_v17, %v3157_v44 }
 0x395   :  { %v967_v27 = vadd.f32 %v963_v20, %v3153_v25  ;;  %v968_v32 = vadd.f32 %v964_v24, %v3154_v31  ;;  %v970_v16 = vadd.f32 %v966_v58, %v3156_v47  ;;  %v969_v26 = vadd.f32 %v965_v42, %v3158_v62 }
 0x3de   :  { %v988_v33 = vpop.f32.mrf.mxu0  ;;  %v1008_v34 = vpop.f32.mrf.mxu1 }
 0x3df   :  { %v1051_v38 = vadd.f32 %v988_v33, %v967_v27  ;;  %v1052_v29 = vadd.f32 %v1008_v34, %v968_v32 }
 0x3e1   :  { %v1470_v53 = vmul.f32 -1.442695, %v1051_v38  ;;  %v1471_v49 = vmul.f32 -1.442695, %v1052_v29 }
 0x3e3   :  { %1584 = vpow2.f32 %v1470_v53 }
 0x3e4   :  { %1586 = vpow2.f32 %v1471_v49 }
 0x3e5   :  { %v1048_v50 = vpop.f32.mrf.mxu3  ;;  %v1028_v39 = vpop.f32.mrf.mxu2 }
 0x3e6   :  { %v1054_v40 = vadd.f32 %v1048_v50, %v970_v16  ;;  %v1053_v48 = vadd.f32 %v1028_v39, %v969_v26 }
 0x3e8   :  { %v1472_v51 = vmul.f32 -1.442695, %v1054_v40 }
 0x3e9   :  { %v1585_v22 = vpop.eup %1584 }
 0x3ea   :  { %v1587_v35 = vpop.eup %1586  ;;  %v1058_v0 = vadd.f32 1.0, %v1585_v22  ;;  %1588 = vpow2.f32 %v1472_v51 }
 0x3eb   :  { %v1077_v7 = vadd.f32 1.0, %v1587_v35 }
 0x3ec   :  { %1590 = vrcp.f32 %v1058_v0  ;;  %v1070_v54 = vand.u32 2147483648, %v1058_v0  ;;  %v1068_v60 = vand.u32 2147483647, %v1058_v0  ;;  %vm1064_vm14 = vweird.f32 %v1058_v0 }
 0x3ed   :  { %1592 = vrcp.f32 %v1077_v7  ;;  %v1089_v30 = vand.u32 2147483648, %v1077_v7  ;;  %v1087_v13 = vand.u32 2147483647, %v1077_v7  ;;  %vm1083_vm15 = vweird.f32 %v1077_v7 }
 0x3ee   :  { %v1071_v63 = vor.u32 1.1754944e-38, %v1070_v54  ;;  %vm1069_vm2 = vcmp.eq.f32.partialorder %v1068_v60, 8.507059e+37 }
 0x3ef   :  { %v1090_v56 = vor.u32 1.1754944e-38, %v1089_v30  ;;  %vm1088_vm3 = vcmp.eq.f32.partialorder %v1087_v13, 8.507059e+37 }
 0x3f0   :  { %v1589_v57 = vpop.eup %1588 }
 0x3f1   :  { %v1097_v45 = vadd.f32 1.0, %v1589_v57 }
 0x3f2   :  { %v1591_v18 = vpop.eup %1590 }
 0x3f3   :  { %v1593_v37 = vpop.eup %1592  ;;  %v1060_v9 = vmul.f32 %v1591_v18, %v1058_v0  ;;  %1594 = vrcp.f32 %v1097_v45  ;;  %vm1065_vm12 = vweird.f32 %v1591_v18  ;;  %v1109_v24 = vand.u32 2147483648, %v1097_v45 }
 0x3f4   :  { %v1079_v28 = vmul.f32 %v1593_v37, %v1077_v7  ;;  %1596 = vtanh.f32 %v1053_v48  ;;  %vm1084_vm13 = vweird.f32 %v1593_v37  ;;  %vm1066_vm0 = vmor %vm1064_vm14, %vm1065_vm12  ;;  %vm1103_vm5 = vweird.f32 %v1097_v45 }
 0x3f5   :  { %v1061_v41 = vsub.f32 1.0, %v1060_v9  ;;  %vm1085_vm1 = vmor %vm1083_vm15, %vm1084_vm13  ;;  %v1107_v27 = vand.u32 2147483647, %v1097_v45  ;;  %v1110_v33 = vor.u32 1.1754944e-38, %v1109_v24  ;;  %v1876_v9 = vmov 7  }
 0x3f6   :  { %v1080_v1 = vsub.f32 1.0, %v1079_v28  ;;  %1502 = vset.pattern.permute.xlu2 %v1876_v9 }
 0x3f7   :  { %v1062_v43 = vmul.f32 %v1591_v18, %v1061_v41  ;;  %vm1108_vm7 = vcmp.eq.f32.partialorder %v1107_v27, 8.507059e+37 }
 0x3f8   :  { %v1081_v11 = vmul.f32 %v1593_v37, %v1080_v1  ;;  %v1709_v1 = vld [vmem:[#allocation2] sm:$0xff] }
 0x3f9   :  { %v1595_v21 = vpop.eup %1594  ;;  %v1063_v52 = vadd.f32 %v1591_v18, %v1062_v43  ;;  %164 = vperm.xlu2 %1502, %v1709_v1  }
 0x3fa   :  { %v1082_v10 = vadd.f32 %v1593_v37, %v1081_v11  ;;  %v1099_v36 = vmul.f32 %v1595_v21, %v1097_v45  ;;  %v1597_v3 = vpop.eup %1596  ;;  %vm1104_vm4 = vweird.f32 %v1595_v21 }
 0x3fb   :  { %v1067_v2 = vsel %vm1066_vm0, %v1591_v18, %v1063_v52  ;;  %vm1105_vm6 = vmor %vm1103_vm5, %vm1104_vm4 }
 0x3fc   :  { %v1072_v4 = vsel %vm1069_vm2, %v1071_v63, %v1067_v2  ;;  %v1086_v5 = vsel %vm1085_vm1, %v1593_v37, %v1082_v10  ;;  %v1100_v6 = vsub.f32 1.0, %v1099_v36 }
 0x3fd   :  { %v1091_v8 = vsel %vm1088_vm3, %v1090_v56, %v1086_v5  ;;  %v1114_v12 = vmul.f32 %v1597_v3, %v1072_v4 }
 0x3fe   :  { %v1113_v14 = vmul.f32 %v1091_v8, %v2698_v59  ;;  %v1101_v15 = vmul.f32 %v1595_v21, %v1100_v6  ;;  %v1120_v59 = vpop.permute.xlu1 %1119 }
 0x3ff   :  { %v1122_v58 = vmul.f32 %v1120_v59, %v3151_v19  ;;  %v1123_v53 = vmul.f32 %v1120_v59, %v3152_v23  ;;  %v1125_v35 = vmul.f32 %v1120_v59, %v3155_v55  ;;  %v1124_v48 = vmul.f32 %v1120_v59, %v3157_v44 }
 0x400   :  { %v2775_v17 = vadd.f32 %v1114_v12, %v1113_v14  ;;  %v1102_v20 = vadd.f32 %v1595_v21, %v1101_v15 }
 0x401   :  { %v1126_v49 = vadd.f32 %v1122_v58, %v3153_v25  ;;  %v1127_v16 = vadd.f32 %v1123_v53, %v3154_v31  ;;  %v1129_v42 = vadd.f32 %v1125_v35, %v3156_v47  ;;  %v1128_v41 = vadd.f32 %v1124_v48, %v3158_v62  ;;  %v177_v35 = vld [vmem:[%s2819_s5] sm:$0xf]  ;;  %s1877_s5 = smov [#allocation11]  }
 0x402   :  { %1598 = vtanh.f32 %v2775_v17  ;;  %v1106_v32 = vsel %vm1105_vm6, %v1595_v21, %v1102_v20  ;;  %v180_v1 = vperm.slane %v177_v35, 2  ;;  %s1439_s21 = sshll.u32 %s1877_s5, 4  ;;  %s1440_s21 = int_to_ptr.vmem [resolvable:$true] %s1439_s21 }
 0x403   :  { %v1111_v38 = vsel %vm1108_vm7, %v1110_v33, %v1106_v32 }
 0x408   :  { %v1599_v34 = vpop.eup %1598 }
 0x409   :  { %v1117_v29 = vmul.f32 %v1599_v34, %v1111_v38 }
 0x40b   :  { %1146 = vmatmul.f32.vlgmr.msrb.gmra.mxu0 %v1117_v29  ;;  %1166 = vmatmul.f32.vlgmr.msrb.gmra.mxu1 %v1117_v29 }
 0x40c   :  { %1186 = vmatmul.f32.vlgmr.msrb.gmra.mxu2 %v1117_v29  ;;  %1206 = vmatmul.f32.vlgmr.msrb.gmra.mxu3 %v1117_v29 }
 0x488   :  { %v1147_v50 = vpop.f32.mrf.mxu0  ;;  %v1167_v40 = vpop.f32.mrf.mxu1 }
 0x489   :  { %v1210_v51 = vadd.f32 %v1147_v50, %v1126_v49  ;;  %v1211_v22 = vadd.f32 %v1167_v40, %v1127_v16 }
 0x48b   :  { %v1473_v0 = vmul.f32 -1.442695, %v1210_v51  ;;  %v1474_v7 = vmul.f32 -1.442695, %v1211_v22 }
 0x48d   :  { %1600 = vpow2.f32 %v1473_v0 }
 0x48e   :  { %1602 = vpow2.f32 %v1474_v7 }
 0x48f   :  { %v1207_v39 = vpop.f32.mrf.mxu3  ;;  %v1187_v37 = vpop.f32.mrf.mxu2 }
 0x490   :  { %v1213_v46 = vadd.f32 %v1207_v39, %v1129_v42  ;;  %v1212_v43 = vadd.f32 %v1187_v37, %v1128_v41  ;;  %v179_v42 = vperm.slane %v177_v35, 0  ;;  %v2793_v39 = vpop.permute.xlu2 %164 }
 0x492   :  { %v1475_v57 = vmul.f32 -1.442695, %v1213_v46 }
 0x493   :  { %v1601_v26 = vpop.eup %1600 }
 0x494   :  { %v1603_v61 = vpop.eup %1602  ;;  %v1217_v45 = vadd.f32 1.0, %v1601_v26  ;;  %1604 = vpow2.f32 %v1475_v57  ;;  %v181_v57 = vperm.slane %v177_v35, 3 }
 0x495   :  { %v1236_v18 = vadd.f32 1.0, %v1603_v61 }
 0x496   :  { %1606 = vrcp.f32 %v1217_v45  ;;  %v1229_v63 = vand.u32 2147483648, %v1217_v45  ;;  %v1227_v56 = vand.u32 2147483647, %v1217_v45  ;;  %vm1223_vm10 = vweird.f32 %v1217_v45 }
 0x497   :  { %1608 = vrcp.f32 %v1236_v18  ;;  %v1248_v10 = vand.u32 2147483648, %v1236_v18  ;;  %v1246_v3 = vand.u32 2147483647, %v1236_v18  ;;  %vm1242_vm11 = vweird.f32 %v1236_v18 }
 0x498   :  { %v1230_v6 = vor.u32 1.1754944e-38, %v1229_v63  ;;  %vm1228_vm14 = vcmp.eq.f32.partialorder %v1227_v56, 8.507059e+37 }
 0x499   :  { %v1249_v14 = vor.u32 1.1754944e-38, %v1248_v10  ;;  %vm1247_vm15 = vcmp.eq.f32.partialorder %v1246_v3, 8.507059e+37 }
 0x49a   :  { %v1605_v28 = vpop.eup %1604 }
 0x49b   :  { %v1256_v54 = vadd.f32 1.0, %v1605_v28 }
 0x49c   :  { %v1607_v30 = vpop.eup %1606 }
 0x49d   :  { %v1609_v60 = vpop.eup %1608  ;;  %v1219_v11 = vmul.f32 %v1607_v30, %v1217_v45  ;;  %1610 = vrcp.f32 %v1256_v54  ;;  %vm1224_vm8 = vweird.f32 %v1607_v30  ;;  %v1268_v53 = vand.u32 2147483648, %v1256_v54 }
 0x49e   :  { %v1238_v13 = vmul.f32 %v1609_v60, %v1236_v18  ;;  %1612 = vtanh.f32 %v1212_v43  ;;  %vm1243_vm9 = vweird.f32 %v1609_v60  ;;  %vm1225_vm12 = vmor %vm1223_vm10, %vm1224_vm8  ;;  %vm1262_vm1 = vweird.f32 %v1256_v54 }
 0x49f   :  { %v1220_v21 = vsub.f32 1.0, %v1219_v11  ;;  %vm1244_vm13 = vmor %vm1242_vm11, %vm1243_vm9  ;;  %v1266_v49 = vand.u32 2147483647, %v1256_v54  ;;  %v1269_v50 = vor.u32 1.1754944e-38, %v1268_v53 }
 0x4a0   :  { %v1239_v52 = vsub.f32 1.0, %v1238_v13 }
 0x4a1   :  { %v1221_v36 = vmul.f32 %v1607_v30, %v1220_v21  ;;  %vm1267_vm3 = vcmp.eq.f32.partialorder %v1266_v49, 8.507059e+37 }
 0x4a2   :  { %v1240_v2 = vmul.f32 %v1609_v60, %v1239_v52 }
 0x4a3   :  { %v1611_v4 = vpop.eup %1610  ;;  %v1222_v5 = vadd.f32 %v1607_v30, %v1221_v36 }
 0x4a4   :  { %v1241_v8 = vadd.f32 %v1609_v60, %v1240_v2  ;;  %v1258_v12 = vmul.f32 %v1611_v4, %v1256_v54  ;;  %v1613_v20 = vpop.eup %1612  ;;  %vm1263_vm0 = vweird.f32 %v1611_v4 }
 0x4a5   :  { %v1226_v15 = vsel %vm1225_vm12, %v1607_v30, %v1222_v5  ;;  %vm1264_vm2 = vmor %vm1262_vm1, %vm1263_vm0 }
 0x4a6   :  { %v1231_v24 = vsel %vm1228_vm14, %v1230_v6, %v1226_v15  ;;  %v1245_v27 = vsel %vm1244_vm13, %v1609_v60, %v1241_v8  ;;  %v1259_v32 = vsub.f32 1.0, %v1258_v12 }
 0x4a7   :  { %v1250_v33 = vsel %vm1247_vm15, %v1249_v14, %v1245_v27  ;;  %v1273_v34 = vmul.f32 %v1613_v20, %v1231_v24 }
 0x4a8   :  { %v1272_v38 = vmul.f32 %v1250_v33, %v2775_v17  ;;  %v1260_v29 = vmul.f32 %v1611_v4, %v1259_v32  ;;  %v161_v17 = vld [vmem:[#allocation10] sm:$0xf] }
 0x4a9   :  { %v168_v0 = vperm.slane %v161_v17, 0  ;;  %v170_v7 = vperm.slane %v161_v17, 3  ;;  %v169_v28 = vperm.slane %v161_v17, 2 }
 0x4aa   :  { %v2787_v59 = vadd.f32 %v1273_v34, %v1272_v38  ;;  %v1261_v58 = vadd.f32 %v1611_v4, %v1260_v29  ;;  %v1277_v38 = vmul.f32 %v3151_v19, %v2793_v39  ;;  %v1278_v29 = vmul.f32 %v3152_v23, %v2793_v39 }
 0x4ab   :  { %v174_v46 = vmul.f32 %v168_v0, %v2793_v39  ;;  %v176_v26 = vmul.f32 %v170_v7, %v2793_v39  ;;  %v175_v54 = vmul.f32 %v169_v28, %v2793_v39 }
 0x4ac   :  { %1614 = vtanh.f32 %v2787_v59  ;;  %v1265_v16 = vsel %vm1264_vm2, %v1611_v4, %v1261_v58  ;;  %v1281_v58 = vadd.f32 %v1277_v38, %v3153_v25  ;;  %v1282_v53 = vadd.f32 %v1278_v29, %v3154_v31 }
 0x4ad   :  { %v1270_v51 = vsel %vm1267_vm3, %v1269_v50, %v1265_v16  ;;  %v185_v61 = vadd.f32 %v179_v42, %v174_v46  ;;  %v187_v18 = vadd.f32 %v181_v57, %v176_v26  ;;  %v186_v60 = vadd.f32 %v180_v1, %v175_v54 }
 0x4ae   :  { %v1279_v46 = vmul.f32 %v3157_v44, %v2793_v39 }
 0x4af   :  { %v1453_v45 = vmul.f32 -1.442695, %v185_v61  ;;  %v1454_v48 = vmul.f32 -1.442695, %v187_v18 }
 0x4b0   :  { %v1283_v26 = vadd.f32 %v1279_v46, %v3158_v62 }
 0x4b1   :  { %1616 = vpow2.f32 %v1453_v45 }
 0x4b2   :  { %v1615_v40 = vpop.eup %1614  ;;  %1618 = vpow2.f32 %v1454_v48 }
 0x4b3   :  { %v1276_v22 = vmul.f32 %v1615_v40, %v1270_v51  ;;  %v1280_v51 = vmul.f32 %v3155_v55, %v2793_v39 }
 0x4b5   :  { %1301 = vmatmul.f32.vlgmr.msra.gmra.mxu0 %v1276_v22  ;;  %1321 = vmatmul.f32.vlgmr.msra.gmra.mxu1 %v1276_v22  ;;  %v1284_v19 = vadd.f32 %v1280_v51, %v3156_v47 }
 0x4b6   :  { %1341 = vmatmul.f32.vlgmr.msra.gmra.mxu2 %v1276_v22  ;;  %1361 = vmatmul.f32.vlgmr.msra.gmra.mxu3 %v1276_v22 }
 0x4b7   :  { %v1617_v37 = vpop.eup %1616 }
 0x4b8   :  { %v191_v9 = vadd.f32 1.0, %v1617_v37  ;;  %v1619_v41 = vpop.eup %1618 }
 0x4b9   :  { %v212_v30 = vadd.f32 1.0, %v1619_v41 }
 0x4ba   :  { %1620 = vrcp.f32 %v191_v9  ;;  %v203_v52 = vand.u32 2147483648, %v191_v9  ;;  %vm197_vm4 = vweird.f32 %v191_v9  ;;  %v201_v36 = vand.u32 2147483647, %v191_v9 }
 0x4bb   :  { %1622 = vrcp.f32 %v212_v30  ;;  %v224_v14 = vand.u32 2147483648, %v212_v30  ;;  %vm218_vm8 = vweird.f32 %v212_v30  ;;  %v222_v20 = vand.u32 2147483647, %v212_v30 }
 0x4bc   :  { %1624 = vtanh.f32 %v186_v60  ;;  %v204_v2 = vor.u32 1.1754944e-38, %v203_v52  ;;  %vm202_vm7 = vcmp.eq.f32.partialorder %v201_v36, 8.507059e+37 }
 0x4bd   :  { %v225_v24 = vor.u32 1.1754944e-38, %v224_v14  ;;  %vm223_vm11 = vcmp.eq.f32.partialorder %v222_v20, 8.507059e+37 }
 0x4c0   :  { %v1621_v43 = vpop.eup %1620 }
 0x4c1   :  { %v193_v11 = vmul.f32 %v1621_v43, %v191_v9  ;;  %v1623_v63 = vpop.eup %1622  ;;  %vm198_vm5 = vweird.f32 %v1621_v43 }
 0x4c2   :  { %v1625_v56 = vpop.eup %1624  ;;  %vm199_vm6 = vmor %vm197_vm4, %vm198_vm5  ;;  %v214_v5 = vmul.f32 %v1623_v63, %v212_v30  ;;  %vm219_vm9 = vweird.f32 %v1623_v63 }
 0x4c3   :  { %v194_v13 = vsub.f32 1.0, %v193_v11  ;;  %vm220_vm10 = vmor %vm218_vm8, %vm219_vm9 }
 0x4c4   :  { %v215_v8 = vsub.f32 1.0, %v214_v5 }
 0x4c5   :  { %v195_v21 = vmul.f32 %v1621_v43, %v194_v13 }
 0x4c6   :  { %v216_v12 = vmul.f32 %v1623_v63, %v215_v8 }
 0x4c7   :  { %v196_v10 = vadd.f32 %v1621_v43, %v195_v21 }
 0x4c8   :  { %v217_v15 = vadd.f32 %v1623_v63, %v216_v12 }
 0x4c9   :  { %v200_v3 = vsel %vm199_vm6, %v1621_v43, %v196_v10 }
 0x4ca   :  { %v205_v4 = vsel %vm202_vm7, %v204_v2, %v200_v3  ;;  %v221_v27 = vsel %vm220_vm10, %v1623_v63, %v217_v15 }
 0x4cb   :  { %v208_v6 = vmul.f32 %v1625_v56, %v205_v4  ;;  %v226_v33 = vsel %vm223_vm11, %v225_v24, %v221_v27 }
 0x4cd   :  { %1626 = vtanh.f32 %v208_v6 }
 0x4d3   :  { %v1627_v32 = vpop.eup %1626 }
 0x4d4   :  { %v229_v34 = vmul.f32 %v1627_v32, %v226_v33 }
 0x4d6   :  { %1433 = vst [vmem:[#allocation11 + $0x8] sm:$0xff] %v229_v34 }
 0x532   :  { %v1302_v49 = vpop.f32.mrf.mxu0  ;;  %v1322_v16 = vpop.f32.mrf.mxu1 }
 0x533   :  { %v1365_v50 = vadd.f32 %v1302_v49, %v1281_v58  ;;  %v1366_v40 = vadd.f32 %v1322_v16, %v1282_v53 }
 0x535   :  { %v1476_v22 = vmul.f32 -1.442695, %v1365_v50  ;;  %v1477_v17 = vmul.f32 -1.442695, %v1366_v40 }
 0x537   :  { %1628 = vpow2.f32 %v1476_v22 }
 0x538   :  { %1630 = vpow2.f32 %v1477_v17 }
 0x539   :  { %v1362_v35 = vpop.f32.mrf.mxu3  ;;  %v1342_v55 = vpop.f32.mrf.mxu2 }
 0x53a   :  { %v1368_v0 = vadd.f32 %v1362_v35, %v1284_v19  ;;  %v1367_v47 = vadd.f32 %v1342_v55, %v1283_v26 }
 0x53c   :  { %v1478_v23 = vmul.f32 -1.442695, %v1368_v0 }
 0x53d   :  { %v1629_v7 = vpop.eup %1628 }
 0x53e   :  { %v1631_v25 = vpop.eup %1630  ;;  %v1372_v42 = vadd.f32 1.0, %v1629_v7  ;;  %1632 = vpow2.f32 %v1478_v23 }
 0x53f   :  { %v1391_v31 = vadd.f32 1.0, %v1631_v25 }
 0x540   :  { %1634 = vrcp.f32 %v1372_v42  ;;  %v1384_v41 = vand.u32 2147483648, %v1372_v42  ;;  %v1382_v44 = vand.u32 2147483647, %v1372_v42  ;;  %vm1378_vm14 = vweird.f32 %v1372_v42 }
 0x541   :  { %1636 = vrcp.f32 %v1391_v31  ;;  %v1403_v1 = vand.u32 2147483648, %v1391_v31  ;;  %v1401_v30 = vand.u32 2147483647, %v1391_v31  ;;  %vm1397_vm15 = vweird.f32 %v1391_v31 }
 0x542   :  { %v1385_v60 = vor.u32 1.1754944e-38, %v1384_v41  ;;  %vm1383_vm2 = vcmp.eq.f32.partialorder %v1382_v44, 8.507059e+37 }
 0x543   :  { %v1404_v21 = vor.u32 1.1754944e-38, %v1403_v1  ;;  %vm1402_vm3 = vcmp.eq.f32.partialorder %v1401_v30, 8.507059e+37 }
 0x544   :  { %v1633_v57 = vpop.eup %1632 }
 0x545   :  { %v1411_v61 = vadd.f32 1.0, %v1633_v57 }
 0x546   :  { %v1635_v45 = vpop.eup %1634 }
 0x547   :  { %v1637_v18 = vpop.eup %1636  ;;  %v1374_v48 = vmul.f32 %v1635_v45, %v1372_v42  ;;  %1638 = vrcp.f32 %v1411_v61  ;;  %vm1379_vm12 = vweird.f32 %v1635_v45  ;;  %v1423_v12 = vand.u32 2147483648, %v1411_v61 }
 0x548   :  { %v1393_v37 = vmul.f32 %v1637_v18, %v1391_v31  ;;  %1640 = vtanh.f32 %v1367_v47  ;;  %vm1398_vm13 = vweird.f32 %v1637_v18  ;;  %vm1380_vm0 = vmor %vm1378_vm14, %vm1379_vm12  ;;  %vm1417_vm5 = vweird.f32 %v1411_v61 }
 0x549   :  { %v1375_v9 = vsub.f32 1.0, %v1374_v48  ;;  %vm1399_vm1 = vmor %vm1397_vm15, %vm1398_vm13  ;;  %v1421_v14 = vand.u32 2147483647, %v1411_v61  ;;  %v1424_v20 = vor.u32 1.1754944e-38, %v1423_v12 }
 0x54a   :  { %v1394_v28 = vsub.f32 1.0, %v1393_v37 }
 0x54b   :  { %v1376_v54 = vmul.f32 %v1635_v45, %v1375_v9  ;;  %vm1422_vm7 = vcmp.eq.f32.partialorder %v1421_v14, 8.507059e+37 }
 0x54c   :  { %v1395_v39 = vmul.f32 %v1637_v18, %v1394_v28 }
 0x54d   :  { %v1639_v43 = vpop.eup %1638  ;;  %v1377_v62 = vadd.f32 %v1635_v45, %v1376_v54 }
 0x54e   :  { %v1396_v11 = vadd.f32 %v1637_v18, %v1395_v39  ;;  %v1413_v13 = vmul.f32 %v1639_v43, %v1411_v61  ;;  %v1641_v63 = vpop.eup %1640  ;;  %vm1418_vm4 = vweird.f32 %v1639_v43 }
 0x54f   :  { %v1381_v52 = vsel %vm1380_vm0, %v1635_v45, %v1377_v62  ;;  %vm1419_vm6 = vmor %vm1417_vm5, %vm1418_vm4 }
 0x550   :  { %v1386_v10 = vsel %vm1383_vm2, %v1385_v60, %v1381_v52  ;;  %v1400_v36 = vsel %vm1399_vm1, %v1637_v18, %v1396_v11  ;;  %v1414_v56 = vsub.f32 1.0, %v1413_v13 }
 0x551   :  { %v1405_v2 = vsel %vm1402_vm3, %v1404_v21, %v1400_v36  ;;  %v1428_v3 = vmul.f32 %v1641_v63, %v1386_v10 }
 0x552   :  { %v1427_v4 = vmul.f32 %v1405_v2, %v2787_v59  ;;  %v1415_v5 = vmul.f32 %v1639_v43, %v1414_v56 }
 0x554   :  { %v1429_v6 = vadd.f32 %v1428_v3, %v1427_v4  ;;  %v1416_v8 = vadd.f32 %v1639_v43, %v1415_v5 }
 0x556   :  { %1642 = vtanh.f32 %v1429_v6  ;;  %v1420_v15 = vsel %vm1419_vm6, %v1639_v43, %v1416_v8 }
 0x557   :  { %v1425_v59 = vsel %vm1422_vm7, %v1424_v20, %v1420_v15 }
 0x55c   :  { %v1643_v24 = vpop.eup %1642 }
 0x55d   :  { %v1431_v27 = vmul.f32 %v1643_v24, %v1425_v59 }
 0x55f   :  { %1432 = vst [vmem:[#allocation11] sm:$0xff] %v1431_v27 }
 0x560   :  { %1444 = dma.vmem_to_hbm [thread:$0]  %s1440_s21, 256, %s1442_s24, [#allocation4]  }
 0x561   :  { %1860 = dma.done.wait [#allocation4], 256  }
 0x562   :  { %1861 = vsyncadd [#allocation4], 4294967040 }
 0x563   :  { %1449 = vsyncpa [#allocation3], 1 }
 0x564   :  { %1450 = vsyncpa [#allocation6], 1 }
 0x565   :  { %1451 = vsyncpa [#allocation9], 1 }
 0x566   :  { %1452 = vsyncpa [#allocation4], 1 }

</bundles_post_ra>
